<compile_context>
chip_gen: v7x
topology: tpu7x:2x2x1
jax: 0.10.0
libtpu: 0.0.40
codegen_flags: <defaults>
</compile_context>

<pallas_src>
import jax
import jax.numpy as jnp
from jax.experimental import pallas as pl
from jax.experimental.pallas import tpu as pltpu

NUM_TABLES = 7  # R, E1..E6
LANE = 128


def _mcp_kernel(idx_ref, *refs):
    """idx_ref: (7, TB) int32; refs = 7 table refs (2, emb, rows_pad) bf16 + out (1, TB) f32."""
    table_refs = refs[:NUM_TABLES]
    out_ref = refs[NUM_TABLES]
    tb = out_ref.shape[-1]

    idx = idx_ref[...]                                            # (7, TB) int32
    max_rows = max(r.shape[-1] for r in table_refs)
    # Hoisted: one iota materialization shared by all 7 one-hot builds.
    row_iota = jax.lax.broadcasted_iota(jnp.int32, (max_rows, tb), 0)

    acc = None
    for t in range(NUM_TABLES):
        rows = table_refs[t].shape[-1]
        ids = idx[t:t + 1, :]                                     # (1, TB)
        # bf16 one-hot gather: 0/1 exact in bf16; padded / OOB rows give 0.
        onehot = (row_iota[:rows, :] == ids).astype(jnp.bfloat16)  # (rows_pad, TB)
        hi = table_refs[t][0]                                     # (emb, rows_pad) bf16
        lo = table_refs[t][1]                                     # bf16 residual
        # Two single-pass bf16 MXU matmuls, f32 accumulation: gather of (hi+lo),
        # i.e. the f32 table to ~2^-17 relative.
        g = (jnp.dot(hi, onehot, preferred_element_type=jnp.float32)
             + jnp.dot(lo, onehot, preferred_element_type=jnp.float32))  # (emb, TB)
        acc = g if acc is None else acc * g                       # VPU product chain
    # TODO(synk): hidden_drop is an identity here (inference mode); training-mode
    # dropout would use pltpu.prng_seed + pltpu.prng_random_bits.
    out_ref[...] = jnp.sum(acc, axis=0, keepdims=True)            # (1, TB) lane-dense


def prepare_mcp_tables(tables):
    """One-time preprocessing (hoisted out of the forward hot path).

    For each [rows, emb] f32 table: pad rows to a multiple of 128, transpose to
    (emb, rows_pad), split into bf16 hi/lo halves -> (2, emb, rows_pad) bf16.
    """
    prepped = []
    for t in tables:
        t = jnp.asarray(t, jnp.float32)
        rows, _ = t.shape
        rows_p = pl.cdiv(rows, LANE) * LANE
        tt = jnp.pad(t, ((0, rows_p - rows), (0, 0))).T           # (emb, rows_p) f32
        hi = tt.astype(jnp.bfloat16)
        lo = (tt - hi.astype(jnp.float32)).astype(jnp.bfloat16)
        prepped.append(jnp.stack([hi, lo]))                       # (2, emb, rows_p) bf16
    return tuple(prepped)


@jax.jit
def mcp_forward(prepared_tables, r_idx, e1_idx, e2_idx, e3_idx, e4_idx, e5_idx, e6_idx):
    """prepared_tables: output of prepare_mcp_tables((R, E1..E6)). Returns [batch] f32."""
    assert len(prepared_tables) == NUM_TABLES
    emb_dim = prepared_tables[0].shape[1]
    rows_pads = [t.shape[-1] for t in prepared_tables]
    max_rows = max(rows_pads)

    idx = jnp.stack(
        [r_idx, e1_idx, e2_idx, e3_idx, e4_idx, e5_idx, e6_idx]
    ).astype(jnp.int32)                                           # (7, batch)
    batch = idx.shape[1]

    # Batch tiling: lane-dense tiles, capped at 1024 rows (v5e/v6e overhead
    # amortization), and >= 2 tiles whenever batch > 128 so the "parallel"
    # grid axis can shard across both v7x TensorCores.
    lanes = pl.cdiv(batch, LANE)
    tiles_wanted = 2 if lanes >= 2 else 1
    tb_lanes = min(8, pl.cdiv(lanes, tiles_wanted))
    tb = tb_lanes * LANE
    num_tiles = pl.cdiv(lanes, tb_lanes)
    padded_batch = num_tiles * tb
    # Pad indices with 0 (always a valid row); padded results are sliced away.
    idx_p = jnp.pad(idx, ((0, 0), (0, padded_batch - batch)))

    # VMEM budget: resident tables (single copy; whole-array VMEM operands are
    # not grid-pipelined) + double-buffered idx/out tiles + in-kernel temps.
    table_bytes = sum(int(t.size) * t.dtype.itemsize for t in prepared_tables)
    work_bytes = (NUM_TABLES * tb * 4 * 2        # idx tile (double-buffered)
                  + tb * 4 * 2                   # out tile (double-buffered)
                  + max_rows * tb * 2 * 2        # bf16 one-hot temporaries
                  + emb_dim * tb * 4 * 4)        # gathered tiles / accumulator
    vmem_limit = int(min(48 * 1024 * 1024,
                         max(32 * 1024 * 1024,
                             2 * (table_bytes + work_bytes) + (4 << 20))))

    # Advisory cost estimate: 2 bf16 matmuls per table + elementwise product/sum.
    flops = padded_batch * (sum(4 * emb_dim * r for r in rows_pads)
                            + NUM_TABLES * emb_dim)
    bytes_accessed = table_bytes + NUM_TABLES * padded_batch * 4 + padded_batch * 4
    cost = pl.CostEstimate(flops=int(flops), transcendentals=0,
                           bytes_accessed=int(bytes_accessed))

    out = pl.pallas_call(
        _mcp_kernel,
        out_shape=jax.ShapeDtypeStruct((1, padded_batch), jnp.float32),
        grid=(num_tiles,),
        in_specs=(
            [pl.BlockSpec((NUM_TABLES, tb), lambda i: (0, i))]            # index tile
            + [pl.BlockSpec(memory_space=pltpu.MemorySpace.VMEM)] * NUM_TABLES  # whole tables
        ),
        out_specs=pl.BlockSpec((1, tb), lambda i: (0, i)),                # lane-dense slab
        compiler_params=pltpu.CompilerParams(
            dimension_semantics=("parallel",),   # megacore-shard batch tiles (v7x)
            vmem_limit_bytes=vmem_limit,
        ),
        cost_estimate=cost,
    )(idx_p, *prepared_tables)
    return out.reshape(-1)[:batch]


if __name__ == "__main__":
    key = jax.random.PRNGKey(0)
    num_ent, num_rel, emb_dim = 10, 5, 32
    keys = jax.random.split(key, 20)

    def xavier_normal(k, shape):
        std = (2.0 / (shape[0] + shape[1])) ** 0.5
        return std * jax.random.normal(k, shape, dtype=jnp.float32)

    def ent_table(k):
        # mimics MCP.init(): row 0 = ones (padding idx), rest xavier_normal
        w = xavier_normal(k, (num_ent, emb_dim))
        return w.at[0].set(1.0)

    R = xavier_normal(keys[0], (num_rel, emb_dim))
    E = [ent_table(keys[1 + i]) for i in range(6)]
    tables = (R, *E)
    prepared = prepare_mcp_tables(tables)     # one-time prep, hoisted out of forward

    def reference(r_idx, e_idx):
        gathered = [R[r_idx]] + [E[i][e_idx[i]] for i in range(6)]
        return jnp.sum(jnp.prod(jnp.stack(gathered), axis=0), axis=-1)

    # batch=8 exercises the single-tile path; batch=300 the multi-tile (2-core) path.
    for case, batch in enumerate((8, 300)):
        kb = jax.random.split(keys[10 + case], 8)
        r_idx = jax.random.randint(kb[0], (batch,), 0, num_rel, dtype=jnp.int32)
        e_idx = [jax.random.randint(kb[1 + i], (batch,), 0, num_ent, dtype=jnp.int32)
                 for i in range(6)]
        out = jax.block_until_ready(mcp_forward(prepared, r_idx, *e_idx))
        ref = reference(r_idx, e_idx)
        assert out.shape == (batch,)
        assert jnp.allclose(out, ref, atol=2e-5, rtol=1e-3), (case, out, ref)
    print("KERNEL_OK")
</pallas_src>

<mosaic_0001>
module attributes {stable_mosaic.version = 11 : i64} {
  func.func @_mcp_kernel(%arg0: i32, %arg1: memref<7x128xi32, #tpu.memory_space<vmem>>, %arg2: memref<2x32x128xbf16, #tpu.memory_space<vmem>>, %arg3: memref<2x32x128xbf16, #tpu.memory_space<vmem>>, %arg4: memref<2x32x128xbf16, #tpu.memory_space<vmem>>, %arg5: memref<2x32x128xbf16, #tpu.memory_space<vmem>>, %arg6: memref<2x32x128xbf16, #tpu.memory_space<vmem>>, %arg7: memref<2x32x128xbf16, #tpu.memory_space<vmem>>, %arg8: memref<2x32x128xbf16, #tpu.memory_space<vmem>>, %arg9: memref<1x128xf32, #tpu.memory_space<vmem>>) attributes {dimension_semantics = [#tpu.dimension_semantics<parallel>], iteration_bounds = array<i64: 1>, scalar_prefetch = 0 : i64, scratch_operands = 0 : i64, tpu.core_type = #tpu.core_type<tc>, window_params = [{transform_indices = @transform_0, window_bounds = array<i64: 7, 128>}, {pipeline_mode = #tpu.pipeline_mode<synchronous>, transform_indices = @transform_1, window_bounds = array<i64: 2, 32, 128>}, {pipeline_mode = #tpu.pipeline_mode<synchronous>, transform_indices = @transform_2, window_bounds = array<i64: 2, 32, 128>}, {pipeline_mode = #tpu.pipeline_mode<synchronous>, transform_indices = @transform_3, window_bounds = array<i64: 2, 32, 128>}, {pipeline_mode = #tpu.pipeline_mode<synchronous>, transform_indices = @transform_4, window_bounds = array<i64: 2, 32, 128>}, {pipeline_mode = #tpu.pipeline_mode<synchronous>, transform_indices = @transform_5, window_bounds = array<i64: 2, 32, 128>}, {pipeline_mode = #tpu.pipeline_mode<synchronous>, transform_indices = @transform_6, window_bounds = array<i64: 2, 32, 128>}, {pipeline_mode = #tpu.pipeline_mode<synchronous>, transform_indices = @transform_7, window_bounds = array<i64: 2, 32, 128>}, {transform_indices = @transform_8, window_bounds = array<i64: 1, 128>}]} {
    %c0 = arith.constant 0 : index
    %c0_0 = arith.constant 0 : index
    %0 = vector.load %arg1[%c0, %c0_0] : memref<7x128xi32, #tpu.memory_space<vmem>>, vector<7x128xi32>
    %1 = tpu.iota {dimensions = array<i32: 0>} : vector<128x128xi32>
    %2 = vector.extract_strided_slice %0 {offsets = [0, 0], sizes = [1, 128], strides = [1, 1]} : vector<7x128xi32> to vector<1x128xi32>
    %3 = vector.broadcast %2 : vector<1x128xi32> to vector<128x128xi32>
    %4 = arith.cmpi eq, %1, %3 : vector<128x128xi32>
    %5 = arith.extui %4 : vector<128x128xi1> to vector<128x128xi32>
    %6 = arith.sitofp %5 : vector<128x128xi32> to vector<128x128xf32>
    %7 = arith.truncf %6 : vector<128x128xf32> to vector<128x128xbf16>
    %c0_1 = arith.constant 0 : index
    %c0_2 = arith.constant 0 : index
    %c0_3 = arith.constant 0 : index
    %8 = vector.load %arg2[%c0_1, %c0_2, %c0_3] : memref<2x32x128xbf16, #tpu.memory_space<vmem>>, vector<1x32x128xbf16>
    %9 = vector.shape_cast %8 : vector<1x32x128xbf16> to vector<32x128xbf16>
    %c1 = arith.constant 1 : index
    %c0_4 = arith.constant 0 : index
    %c0_5 = arith.constant 0 : index
    %10 = vector.load %arg2[%c1, %c0_4, %c0_5] : memref<2x32x128xbf16, #tpu.memory_space<vmem>>, vector<1x32x128xbf16>
    %11 = vector.shape_cast %10 : vector<1x32x128xbf16> to vector<32x128xbf16>
    %cst = arith.constant dense<0.000000e+00> : vector<32x128xf32>
    %12 = tpu.matmul %9, %7, %cst {dimension_numbers = #tpu.dot_dimension_numbers<[1], [0], [0], [1], [0, 0, 1, 1], [], []>} : vector<32x128xbf16>, vector<128x128xbf16>, vector<32x128xf32> -> vector<32x128xf32>
    %cst_6 = arith.constant dense<0.000000e+00> : vector<32x128xf32>
    %13 = tpu.matmul %11, %7, %cst_6 {dimension_numbers = #tpu.dot_dimension_numbers<[1], [0], [0], [1], [0, 0, 1, 1], [], []>} : vector<32x128xbf16>, vector<128x128xbf16>, vector<32x128xf32> -> vector<32x128xf32>
    %14 = arith.addf %12, %13 : vector<32x128xf32>
    %15 = vector.extract_strided_slice %0 {offsets = [1, 0], sizes = [1, 128], strides = [1, 1]} : vector<7x128xi32> to vector<1x128xi32>
    %16 = vector.broadcast %15 : vector<1x128xi32> to vector<128x128xi32>
    %17 = arith.cmpi eq, %1, %16 : vector<128x128xi32>
    %18 = arith.extui %17 : vector<128x128xi1> to vector<128x128xi32>
    %19 = arith.sitofp %18 : vector<128x128xi32> to vector<128x128xf32>
    %20 = arith.truncf %19 : vector<128x128xf32> to vector<128x128xbf16>
    %c0_7 = arith.constant 0 : index
    %c0_8 = arith.constant 0 : index
    %c0_9 = arith.constant 0 : index
    %21 = vector.load %arg3[%c0_7, %c0_8, %c0_9] : memref<2x32x128xbf16, #tpu.memory_space<vmem>>, vector<1x32x128xbf16>
    %22 = vector.shape_cast %21 : vector<1x32x128xbf16> to vector<32x128xbf16>
    %c1_10 = arith.constant 1 : index
    %c0_11 = arith.constant 0 : index
    %c0_12 = arith.constant 0 : index
    %23 = vector.load %arg3[%c1_10, %c0_11, %c0_12] : memref<2x32x128xbf16, #tpu.memory_space<vmem>>, vector<1x32x128xbf16>
    %24 = vector.shape_cast %23 : vector<1x32x128xbf16> to vector<32x128xbf16>
    %cst_13 = arith.constant dense<0.000000e+00> : vector<32x128xf32>
    %25 = tpu.matmul %22, %20, %cst_13 {dimension_numbers = #tpu.dot_dimension_numbers<[1], [0], [0], [1], [0, 0, 1, 1], [], []>} : vector<32x128xbf16>, vector<128x128xbf16>, vector<32x128xf32> -> vector<32x128xf32>
    %cst_14 = arith.constant dense<0.000000e+00> : vector<32x128xf32>
    %26 = tpu.matmul %24, %20, %cst_14 {dimension_numbers = #tpu.dot_dimension_numbers<[1], [0], [0], [1], [0, 0, 1, 1], [], []>} : vector<32x128xbf16>, vector<128x128xbf16>, vector<32x128xf32> -> vector<32x128xf32>
    %27 = arith.addf %25, %26 : vector<32x128xf32>
    %28 = arith.mulf %14, %27 : vector<32x128xf32>
    %29 = vector.extract_strided_slice %0 {offsets = [2, 0], sizes = [1, 128], strides = [1, 1]} : vector<7x128xi32> to vector<1x128xi32>
    %30 = vector.broadcast %29 : vector<1x128xi32> to vector<128x128xi32>
    %31 = arith.cmpi eq, %1, %30 : vector<128x128xi32>
    %32 = arith.extui %31 : vector<128x128xi1> to vector<128x128xi32>
    %33 = arith.sitofp %32 : vector<128x128xi32> to vector<128x128xf32>
    %34 = arith.truncf %33 : vector<128x128xf32> to vector<128x128xbf16>
    %c0_15 = arith.constant 0 : index
    %c0_16 = arith.constant 0 : index
    %c0_17 = arith.constant 0 : index
    %35 = vector.load %arg4[%c0_15, %c0_16, %c0_17] : memref<2x32x128xbf16, #tpu.memory_space<vmem>>, vector<1x32x128xbf16>
    %36 = vector.shape_cast %35 : vector<1x32x128xbf16> to vector<32x128xbf16>
    %c1_18 = arith.constant 1 : index
    %c0_19 = arith.constant 0 : index
    %c0_20 = arith.constant 0 : index
    %37 = vector.load %arg4[%c1_18, %c0_19, %c0_20] : memref<2x32x128xbf16, #tpu.memory_space<vmem>>, vector<1x32x128xbf16>
    %38 = vector.shape_cast %37 : vector<1x32x128xbf16> to vector<32x128xbf16>
    %cst_21 = arith.constant dense<0.000000e+00> : vector<32x128xf32>
    %39 = tpu.matmul %36, %34, %cst_21 {dimension_numbers = #tpu.dot_dimension_numbers<[1], [0], [0], [1], [0, 0, 1, 1], [], []>} : vector<32x128xbf16>, vector<128x128xbf16>, vector<32x128xf32> -> vector<32x128xf32>
    %cst_22 = arith.constant dense<0.000000e+00> : vector<32x128xf32>
    %40 = tpu.matmul %38, %34, %cst_22 {dimension_numbers = #tpu.dot_dimension_numbers<[1], [0], [0], [1], [0, 0, 1, 1], [], []>} : vector<32x128xbf16>, vector<128x128xbf16>, vector<32x128xf32> -> vector<32x128xf32>
    %41 = arith.addf %39, %40 : vector<32x128xf32>
    %42 = arith.mulf %28, %41 : vector<32x128xf32>
    %43 = vector.extract_strided_slice %0 {offsets = [3, 0], sizes = [1, 128], strides = [1, 1]} : vector<7x128xi32> to vector<1x128xi32>
    %44 = vector.broadcast %43 : vector<1x128xi32> to vector<128x128xi32>
    %45 = arith.cmpi eq, %1, %44 : vector<128x128xi32>
    %46 = arith.extui %45 : vector<128x128xi1> to vector<128x128xi32>
    %47 = arith.sitofp %46 : vector<128x128xi32> to vector<128x128xf32>
    %48 = arith.truncf %47 : vector<128x128xf32> to vector<128x128xbf16>
    %c0_23 = arith.constant 0 : index
    %c0_24 = arith.constant 0 : index
    %c0_25 = arith.constant 0 : index
    %49 = vector.load %arg5[%c0_23, %c0_24, %c0_25] : memref<2x32x128xbf16, #tpu.memory_space<vmem>>, vector<1x32x128xbf16>
    %50 = vector.shape_cast %49 : vector<1x32x128xbf16> to vector<32x128xbf16>
    %c1_26 = arith.constant 1 : index
    %c0_27 = arith.constant 0 : index
    %c0_28 = arith.constant 0 : index
    %51 = vector.load %arg5[%c1_26, %c0_27, %c0_28] : memref<2x32x128xbf16, #tpu.memory_space<vmem>>, vector<1x32x128xbf16>
    %52 = vector.shape_cast %51 : vector<1x32x128xbf16> to vector<32x128xbf16>
    %cst_29 = arith.constant dense<0.000000e+00> : vector<32x128xf32>
    %53 = tpu.matmul %50, %48, %cst_29 {dimension_numbers = #tpu.dot_dimension_numbers<[1], [0], [0], [1], [0, 0, 1, 1], [], []>} : vector<32x128xbf16>, vector<128x128xbf16>, vector<32x128xf32> -> vector<32x128xf32>
    %cst_30 = arith.constant dense<0.000000e+00> : vector<32x128xf32>
    %54 = tpu.matmul %52, %48, %cst_30 {dimension_numbers = #tpu.dot_dimension_numbers<[1], [0], [0], [1], [0, 0, 1, 1], [], []>} : vector<32x128xbf16>, vector<128x128xbf16>, vector<32x128xf32> -> vector<32x128xf32>
    %55 = arith.addf %53, %54 : vector<32x128xf32>
    %56 = arith.mulf %42, %55 : vector<32x128xf32>
    %57 = vector.extract_strided_slice %0 {offsets = [4, 0], sizes = [1, 128], strides = [1, 1]} : vector<7x128xi32> to vector<1x128xi32>
    %58 = vector.broadcast %57 : vector<1x128xi32> to vector<128x128xi32>
    %59 = arith.cmpi eq, %1, %58 : vector<128x128xi32>
    %60 = arith.extui %59 : vector<128x128xi1> to vector<128x128xi32>
    %61 = arith.sitofp %60 : vector<128x128xi32> to vector<128x128xf32>
    %62 = arith.truncf %61 : vector<128x128xf32> to vector<128x128xbf16>
    %c0_31 = arith.constant 0 : index
    %c0_32 = arith.constant 0 : index
    %c0_33 = arith.constant 0 : index
    %63 = vector.load %arg6[%c0_31, %c0_32, %c0_33] : memref<2x32x128xbf16, #tpu.memory_space<vmem>>, vector<1x32x128xbf16>
    %64 = vector.shape_cast %63 : vector<1x32x128xbf16> to vector<32x128xbf16>
    %c1_34 = arith.constant 1 : index
    %c0_35 = arith.constant 0 : index
    %c0_36 = arith.constant 0 : index
    %65 = vector.load %arg6[%c1_34, %c0_35, %c0_36] : memref<2x32x128xbf16, #tpu.memory_space<vmem>>, vector<1x32x128xbf16>
    %66 = vector.shape_cast %65 : vector<1x32x128xbf16> to vector<32x128xbf16>
    %cst_37 = arith.constant dense<0.000000e+00> : vector<32x128xf32>
    %67 = tpu.matmul %64, %62, %cst_37 {dimension_numbers = #tpu.dot_dimension_numbers<[1], [0], [0], [1], [0, 0, 1, 1], [], []>} : vector<32x128xbf16>, vector<128x128xbf16>, vector<32x128xf32> -> vector<32x128xf32>
    %cst_38 = arith.constant dense<0.000000e+00> : vector<32x128xf32>
    %68 = tpu.matmul %66, %62, %cst_38 {dimension_numbers = #tpu.dot_dimension_numbers<[1], [0], [0], [1], [0, 0, 1, 1], [], []>} : vector<32x128xbf16>, vector<128x128xbf16>, vector<32x128xf32> -> vector<32x128xf32>
    %69 = arith.addf %67, %68 : vector<32x128xf32>
    %70 = arith.mulf %56, %69 : vector<32x128xf32>
    %71 = vector.extract_strided_slice %0 {offsets = [5, 0], sizes = [1, 128], strides = [1, 1]} : vector<7x128xi32> to vector<1x128xi32>
    %72 = vector.broadcast %71 : vector<1x128xi32> to vector<128x128xi32>
    %73 = arith.cmpi eq, %1, %72 : vector<128x128xi32>
    %74 = arith.extui %73 : vector<128x128xi1> to vector<128x128xi32>
    %75 = arith.sitofp %74 : vector<128x128xi32> to vector<128x128xf32>
    %76 = arith.truncf %75 : vector<128x128xf32> to vector<128x128xbf16>
    %c0_39 = arith.constant 0 : index
    %c0_40 = arith.constant 0 : index
    %c0_41 = arith.constant 0 : index
    %77 = vector.load %arg7[%c0_39, %c0_40, %c0_41] : memref<2x32x128xbf16, #tpu.memory_space<vmem>>, vector<1x32x128xbf16>
    %78 = vector.shape_cast %77 : vector<1x32x128xbf16> to vector<32x128xbf16>
    %c1_42 = arith.constant 1 : index
    %c0_43 = arith.constant 0 : index
    %c0_44 = arith.constant 0 : index
    %79 = vector.load %arg7[%c1_42, %c0_43, %c0_44] : memref<2x32x128xbf16, #tpu.memory_space<vmem>>, vector<1x32x128xbf16>
    %80 = vector.shape_cast %79 : vector<1x32x128xbf16> to vector<32x128xbf16>
    %cst_45 = arith.constant dense<0.000000e+00> : vector<32x128xf32>
    %81 = tpu.matmul %78, %76, %cst_45 {dimension_numbers = #tpu.dot_dimension_numbers<[1], [0], [0], [1], [0, 0, 1, 1], [], []>} : vector<32x128xbf16>, vector<128x128xbf16>, vector<32x128xf32> -> vector<32x128xf32>
    %cst_46 = arith.constant dense<0.000000e+00> : vector<32x128xf32>
    %82 = tpu.matmul %80, %76, %cst_46 {dimension_numbers = #tpu.dot_dimension_numbers<[1], [0], [0], [1], [0, 0, 1, 1], [], []>} : vector<32x128xbf16>, vector<128x128xbf16>, vector<32x128xf32> -> vector<32x128xf32>
    %83 = arith.addf %81, %82 : vector<32x128xf32>
    %84 = arith.mulf %70, %83 : vector<32x128xf32>
    %85 = vector.extract_strided_slice %0 {offsets = [6, 0], sizes = [1, 128], strides = [1, 1]} : vector<7x128xi32> to vector<1x128xi32>
    %86 = vector.broadcast %85 : vector<1x128xi32> to vector<128x128xi32>
    %87 = arith.cmpi eq, %1, %86 : vector<128x128xi32>
    %88 = arith.extui %87 : vector<128x128xi1> to vector<128x128xi32>
    %89 = arith.sitofp %88 : vector<128x128xi32> to vector<128x128xf32>
    %90 = arith.truncf %89 : vector<128x128xf32> to vector<128x128xbf16>
    %c0_47 = arith.constant 0 : index
    %c0_48 = arith.constant 0 : index
    %c0_49 = arith.constant 0 : index
    %91 = vector.load %arg8[%c0_47, %c0_48, %c0_49] : memref<2x32x128xbf16, #tpu.memory_space<vmem>>, vector<1x32x128xbf16>
    %92 = vector.shape_cast %91 : vector<1x32x128xbf16> to vector<32x128xbf16>
    %c1_50 = arith.constant 1 : index
    %c0_51 = arith.constant 0 : index
    %c0_52 = arith.constant 0 : index
    %93 = vector.load %arg8[%c1_50, %c0_51, %c0_52] : memref<2x32x128xbf16, #tpu.memory_space<vmem>>, vector<1x32x128xbf16>
    %94 = vector.shape_cast %93 : vector<1x32x128xbf16> to vector<32x128xbf16>
    %cst_53 = arith.constant dense<0.000000e+00> : vector<32x128xf32>
    %95 = tpu.matmul %92, %90, %cst_53 {dimension_numbers = #tpu.dot_dimension_numbers<[1], [0], [0], [1], [0, 0, 1, 1], [], []>} : vector<32x128xbf16>, vector<128x128xbf16>, vector<32x128xf32> -> vector<32x128xf32>
    %cst_54 = arith.constant dense<0.000000e+00> : vector<32x128xf32>
    %96 = tpu.matmul %94, %90, %cst_54 {dimension_numbers = #tpu.dot_dimension_numbers<[1], [0], [0], [1], [0, 0, 1, 1], [], []>} : vector<32x128xbf16>, vector<128x128xbf16>, vector<32x128xf32> -> vector<32x128xf32>
    %97 = arith.addf %95, %96 : vector<32x128xf32>
    %98 = arith.mulf %84, %97 : vector<32x128xf32>
    %cst_55 = arith.constant dense<0.000000e+00> : vector<128xf32>
    %99 = vector.multi_reduction <add>, %98, %cst_55 [0] : vector<32x128xf32> to vector<128xf32>
    %100 = vector.shape_cast %99 : vector<128xf32> to vector<1x128xf32>
    %c0_56 = arith.constant 0 : index
    %c0_57 = arith.constant 0 : index
    %101 = vector.load %arg9[%c0_56, %c0_57] : memref<1x128xf32, #tpu.memory_space<vmem>>, vector<1x128xf32>
    tpu.vector_store %arg9[%c0_56, %c0_57], %100 {strides = array<i32>} : memref<1x128xf32, #tpu.memory_space<vmem>>, vector<1x128xf32>,
    return
  }
  func.func @transform_0(%arg0: i32) -> (i32, i32) {
    %c0_i32 = arith.constant 0 : i32
    %c0_i32_0 = arith.constant 0 : i32
    return %c0_i32, %arg0 : i32, i32
  }
  func.func @transform_1(%arg0: i32) -> (i32, i32, i32) {
    %c0_i32 = arith.constant 0 : i32
    %c0_i32_0 = arith.constant 0 : i32
    %c0_i32_1 = arith.constant 0 : i32
    %c0_i32_2 = arith.constant 0 : i32
    return %c0_i32, %c0_i32_0, %c0_i32_1 : i32, i32, i32
  }
  func.func @transform_2(%arg0: i32) -> (i32, i32, i32) {
    %c0_i32 = arith.constant 0 : i32
    %c0_i32_0 = arith.constant 0 : i32
    %c0_i32_1 = arith.constant 0 : i32
    %c0_i32_2 = arith.constant 0 : i32
    return %c0_i32, %c0_i32_0, %c0_i32_1 : i32, i32, i32
  }
  func.func @transform_3(%arg0: i32) -> (i32, i32, i32) {
    %c0_i32 = arith.constant 0 : i32
    %c0_i32_0 = arith.constant 0 : i32
    %c0_i32_1 = arith.constant 0 : i32
    %c0_i32_2 = arith.constant 0 : i32
    return %c0_i32, %c0_i32_0, %c0_i32_1 : i32, i32, i32
  }
  func.func @transform_4(%arg0: i32) -> (i32, i32, i32) {
    %c0_i32 = arith.constant 0 : i32
    %c0_i32_0 = arith.constant 0 : i32
    %c0_i32_1 = arith.constant 0 : i32
    %c0_i32_2 = arith.constant 0 : i32
    return %c0_i32, %c0_i32_0, %c0_i32_1 : i32, i32, i32
  }
  func.func @transform_5(%arg0: i32) -> (i32, i32, i32) {
    %c0_i32 = arith.constant 0 : i32
    %c0_i32_0 = arith.constant 0 : i32
    %c0_i32_1 = arith.constant 0 : i32
    %c0_i32_2 = arith.constant 0 : i32
    return %c0_i32, %c0_i32_0, %c0_i32_1 : i32, i32, i32
  }
  func.func @transform_6(%arg0: i32) -> (i32, i32, i32) {
    %c0_i32 = arith.constant 0 : i32
    %c0_i32_0 = arith.constant 0 : i32
    %c0_i32_1 = arith.constant 0 : i32
    %c0_i32_2 = arith.constant 0 : i32
    return %c0_i32, %c0_i32_0, %c0_i32_1 : i32, i32, i32
  }
  func.func @transform_7(%arg0: i32) -> (i32, i32, i32) {
    %c0_i32 = arith.constant 0 : i32
    %c0_i32_0 = arith.constant 0 : i32
    %c0_i32_1 = arith.constant 0 : i32
    %c0_i32_2 = arith.constant 0 : i32
    return %c0_i32, %c0_i32_0, %c0_i32_1 : i32, i32, i32
  }
  func.func @transform_8(%arg0: i32) -> (i32, i32) {
    %c0_i32 = arith.constant 0 : i32
    %c0_i32_0 = arith.constant 0 : i32
    return %c0_i32, %arg0 : i32, i32
  }
}

</mosaic_0001>

<bundles_post_ra>
// kernel: mcp_forward.1
= control target key start
LH: loop header
LB: loop body
LE: loop exit
PB: predicated region body
PF: predicated region fallthrough
CT: control target
= control target key end

     0   :  { %13 = vsyncpa [#allocation3], 0  ;;  %s4027_s0 = inlined_call_operand.vmem [shape: s32[7,128], index: 0, kind: input, shape index: {}]   ;;  %s4028_s1 = inlined_call_operand.vmem [shape: bf16[2,32,128], index: 1, kind: input, shape index: {}]   ;;  %s4029_s2 = inlined_call_operand.hbm [shape: bf16[2,32,128], index: 2, kind: input, shape index: {}]   ;;  %s4030_s3 = inlined_call_operand.vmem [shape: bf16[2,32,128], index: 3, kind: input, shape index: {}]   ;;  %s4031_s4 = inlined_call_operand.hbm [shape: bf16[2,32,128], index: 4, kind: input, shape index: {}]   ;;  %s4032_s5 = inlined_call_operand.hbm [shape: bf16[2,32,128], index: 5, kind: input, shape index: {}]   ;;  %s4033_s6 = inlined_call_operand.hbm [shape: bf16[2,32,128], index: 6, kind: input, shape index: {}]   ;;  %s4034_s7 = inlined_call_operand.hbm [shape: bf16[2,32,128], index: 7, kind: input, shape index: {}]   ;;  %s4035_s8 = inlined_call_operand.vmem [shape: f32[1,128], index: 8, kind: output, shape index: {}]  }
   0x1   :  { %14 = vsyncpa [#allocation5], 0 }
   0x2   :  { %15 = vsyncpa [#allocation8], 0  ;;  %s2466_s27 = smov [#allocation4]   ;;  %s2467_s29 = smov [#allocation7]  }
   0x3   :  { %s39_s28 = sshll.u32 %s2466_s27, 4  ;;  %s63_s30 = sshll.u32 %s2467_s29, 4  ;;  %s40_s28 = int_to_ptr.vmem [resolvable:$true] %s39_s28  ;;  %s2519_s30 = int_to_ptr.vmem [resolvable:$true] %s63_s30 }
   0x4   :  { %s2350_s11 = scalar_lea.hbm %s4031_s4, 512 }
   0x5   :  { %p2351_p0 = scmp.ne.s32.totalorder %s4031_s4, %s2350_s11  ;;  %p2354_p1 = scmp.lt.u32.totalorder %s2350_s11, %s4031_s4 }
   0x7   :  { %p2356_p2 = pnand %p2354_p1, %p2351_p0 }
   0x9   :  { %2359 = shalt.err (!%p2356_p2)
}
   0xa   :  { %s2360_s16 = scalar_lea.vmem %s40_s28, 512  ;;  %p2365_p4 = scmp.lt.s32.totalorder %s40_s28, %s40_s28 }
   0xb   :  { %p2361_p3 = scmp.ne.s32.totalorder %s40_s28, %s2360_s16  ;;  %p2366_p5 = scmp.lt.s32.totalorder %s2360_s16, %s2360_s16 }
   0xd   :  { %p2367_p6 = por %p2366_p5, %p2365_p4 }
   0xf   :  { %p2368_p7 = pnand %p2367_p6, %p2361_p3 }
  0x11   :  { %2371 = shalt.err (!%p2368_p7)
}
  0x12   :  { %s2468_s17 = smov 64   ;;  %s2469_s18 = smov 4  }
  0x13   :  { %45 = dma.hbm_to_vmem [thread:$0]  %s4031_s4, 512, %s40_s28, [#allocation5], %s2468_s17, %s2468_s17, %s2469_s18  }
  0x14   :  { %s2372_s23 = scalar_lea.hbm %s4033_s6, 512 }
  0x15   :  { %p2373_p8 = scmp.ne.s32.totalorder %s4033_s6, %s2372_s23  ;;  %p2376_p9 = scmp.lt.u32.totalorder %s2372_s23, %s4033_s6 }
  0x17   :  { %p2378_p10 = pnand %p2376_p9, %p2373_p8 }
  0x19   :  { %2381 = shalt.err (!%p2378_p10)
}
  0x1a   :  { %s2382_s29 = scalar_lea.vmem %s2519_s30, 512  ;;  %p2387_p12 = scmp.lt.s32.totalorder %s2519_s30, %s2519_s30 }
  0x1b   :  { %p2383_p11 = scmp.ne.s32.totalorder %s2519_s30, %s2382_s29  ;;  %p2388_p13 = scmp.lt.s32.totalorder %s2382_s29, %s2382_s29 }
  0x1d   :  { %p2389_p0 = por %p2388_p13, %p2387_p12 }
  0x1f   :  { %p2390_p1 = pnand %p2389_p0, %p2383_p11 }
  0x21   :  { %2393 = shalt.err (!%p2390_p1)
}
  0x22   :  { %69 = dma.hbm_to_vmem [thread:$0]  %s4033_s6, 512, %s2519_s30, [#allocation8], %s2468_s17, %s2468_s17, %s2469_s18  }
  0x23   :  { %s2470_s9 = smov [#allocation2]   ;;  %s2471_s11 = smov [#allocation6]  }
  0x24   :  { %s25_s10 = sshll.u32 %s2470_s9, 4  ;;  %s51_s12 = sshll.u32 %s2471_s11, 4  ;;  %s26_s10 = int_to_ptr.vmem [resolvable:$true] %s25_s10  ;;  %s2556_s12 = int_to_ptr.vmem [resolvable:$true] %s51_s12 }
  0x25   :  { %s2394_s15 = scalar_lea.hbm %s4029_s2, 512 }
  0x26   :  { %p2395_p2 = scmp.ne.s32.totalorder %s4029_s2, %s2394_s15  ;;  %p2398_p3 = scmp.lt.u32.totalorder %s2394_s15, %s4029_s2 }
  0x28   :  { %p2400_p4 = pnand %p2398_p3, %p2395_p2 }
  0x2a   :  { %2403 = shalt.err (!%p2400_p4)
}
  0x2b   :  { %s2404_s6 = scalar_lea.vmem %s26_s10, 512  ;;  %p2409_p6 = scmp.lt.s32.totalorder %s26_s10, %s26_s10 }
  0x2c   :  { %p2405_p5 = scmp.ne.s32.totalorder %s26_s10, %s2404_s6  ;;  %p2410_p7 = scmp.lt.s32.totalorder %s2404_s6, %s2404_s6 }
  0x2e   :  { %p2411_p8 = por %p2410_p7, %p2409_p6 }
  0x30   :  { %p2412_p9 = pnand %p2411_p8, %p2405_p5 }
  0x32   :  { %2415 = shalt.err (!%p2412_p9)
}
  0x33   :  { %31 = dma.hbm_to_vmem [thread:$0]  %s4029_s2, 512, %s26_s10, [#allocation3], %s2468_s17, %s2468_s17, %s2469_s18  }
  0x34   :  { %s2416_s25 = scalar_lea.hbm %s4032_s5, 512 }
  0x35   :  { %p2417_p10 = scmp.ne.s32.totalorder %s4032_s5, %s2416_s25  ;;  %p2420_p11 = scmp.lt.u32.totalorder %s2416_s25, %s4032_s5 }
  0x37   :  { %p2422_p12 = pnand %p2420_p11, %p2417_p10 }
  0x39   :  { %2425 = shalt.err (!%p2422_p12)
}
  0x3a   :  { %s2426_s28 = scalar_lea.vmem %s2556_s12, 512  ;;  %p2431_p0 = scmp.lt.s32.totalorder %s2556_s12, %s2556_s12 }
  0x3b   :  { %p2427_p13 = scmp.ne.s32.totalorder %s2556_s12, %s2426_s28  ;;  %p2432_p1 = scmp.lt.s32.totalorder %s2426_s28, %s2426_s28 }
  0x3d   :  { %p2433_p2 = por %p2432_p1, %p2431_p0 }
  0x3f   :  { %p2434_p3 = pnand %p2433_p2, %p2427_p13 }
  0x41   :  { %2437 = shalt.err (!%p2434_p3)
}
  0x42   :  { %57 = dma.hbm_to_vmem [thread:$0]  %s4032_s5, 512, %s2556_s12, [#allocation5], %s2468_s17, %s2468_s17, %s2469_s18  }
  0x43   :  { %s2472_s10 = smov [#allocation9]   ;;  %s2438_s15 = scalar_lea.hbm %s4034_s7, 512 }
  0x44   :  { %s75_s11 = sshll.u32 %s2472_s10, 4  ;;  %p2439_p4 = scmp.ne.s32.totalorder %s4034_s7, %s2438_s15  ;;  %s76_s11 = int_to_ptr.vmem [resolvable:$true] %s75_s11 }
  0x45   :  { %p2442_p5 = scmp.lt.u32.totalorder %s2438_s15, %s4034_s7 }
  0x47   :  { %p2444_p6 = pnand %p2442_p5, %p2439_p4 }
  0x49   :  { %2447 = shalt.err (!%p2444_p6)
}
  0x4a   :  { %s2448_s6 = scalar_lea.vmem %s76_s11, 512  ;;  %p2453_p8 = scmp.lt.s32.totalorder %s76_s11, %s76_s11 }
  0x4b   :  { %p2449_p7 = scmp.ne.s32.totalorder %s76_s11, %s2448_s6  ;;  %p2454_p9 = scmp.lt.s32.totalorder %s2448_s6, %s2448_s6 }
  0x4d   :  { %p2455_p10 = por %p2454_p9, %p2453_p8 }
  0x4f   :  { %p2456_p11 = pnand %p2455_p10, %p2449_p7 }
  0x51   :  { %2459 = shalt.err (!%p2456_p11)
}
  0x52   :  { %81 = dma.hbm_to_vmem [thread:$0]  %s4034_s7, 512, %s76_s11, [#allocation8], %s2468_s17, %s2468_s17, %s2469_s18  }
  0x53   :  { %2460 = dma.done.wait [#allocation3], 512  }
  0x54   :  { %2461 = vsyncadd [#allocation3], 4294966784 }
  0x55   :  { %2462 = dma.done.wait [#allocation5], 1024  }
  0x56   :  { %2463 = vsyncadd [#allocation5], 4294966272 }
  0x57   :  { %2464 = dma.done.wait [#allocation8], 1024  }
  0x58   :  { %2465 = vsyncadd [#allocation8], 4294966272  ;;  %v99_v0 = vlaneseq  ;;  %v2623_v6 = vld [vmem:[%s4027_s0] sm:$0x7f]  ;;  %v2322_v10 = vld [vmem:[%s4028_s1 + $0x10] sm:$0xff]   ;;  %v4101_v38 = vmov 0 }
  0x59   :  { %v2323_v11 = vld [vmem:[%s4028_s1] sm:$0xff]   ;;  %2022 = vmatprep.mubr.bf16.mxu1 %v2322_v10  ;;  %v2473_v13 = vmov 1.0|1.0   ;;  %v4104_v39 = vmov 0  ;;  %v4108_v40 = vmov 0  ;;  %v4112_v41 = vmov 0 }
  0x5a   :  { %v2608_v1 = vshrl.u32 %v99_v0, 7  ;;  %2042 = vmatprep.mubr.bf16.mxu0 %v2323_v11  ;;  %v4116_v42 = vmov 0  ;;  %v4120_v43 = vmov 0  ;;  %v4124_v44 = vmov 0  ;;  %v2324_v45 = vld [vmem:[%s4028_s1 + $0x18] sm:$0xff]   ;;  %v2325_v46 = vld [vmem:[%s4028_s1 + $0x8] sm:$0xff]  }
  0x5b   :  { %v4128_v47 = vmov 0  ;;  %v4131_v50 = vmov 0  ;;  %v4133_v51 = vmov 0  ;;  %v4137_v52 = vmov 0  ;;  %v2326_v57 = vld [vmem:[#allocation2 + $0x10] sm:$0xff]   ;;  %v2329_v34 = vld [vmem:[%s4030_s3 + $0x18] sm:$0xff]  }
  0x5c   :  { %v118_v2 = vsub.s32 0, %v2608_v1  ;;  %v2612_v3 = vadd.s32 8, %v2608_v1  ;;  %v2615_v4 = vadd.s32 16, %v2608_v1  ;;  %v2618_v5 = vadd.s32 24, %v2608_v1  ;;  %v2327_v58 = vld [vmem:[%s4030_s3 + $0x10] sm:$0xff]   ;;  %v2332_v35 = vld [vmem:[#allocation2 + $0x8] sm:$0xff]  }
  0x5d   :  { %v2626_v7 = vadd.s32 32, %v2608_v1  ;;  %v2632_v9 = vadd.s32 40, %v2608_v1  ;;  %v2649_v12 = vadd.s32 48, %v2608_v1  ;;  %v2662_v15 = vadd.s32 56, %v2608_v1  ;;  %v2333_v36 = vld [vmem:[%s4030_s3 + $0x8] sm:$0xff]   ;;  %v2334_v37 = vld [vmem:[#allocation4 + $0x10] sm:$0xff]  }
  0x5e   :  { %v2629_v8 = vrot.slane %v2623_v6, %v118_v2  ;;  %v699_v16 = vsub.s32 3, %v2608_v1  ;;  %v894_v17 = vsub.s32 4, %v2608_v1  ;;  %v2679_v19 = vadd.s32 64, %v2608_v1 }
  0x5f   :  { %v309_v20 = vsub.s32 1, %v2608_v1  ;;  %v2693_v23 = vadd.s32 72, %v2608_v1  ;;  %v504_v24 = vsub.s32 2, %v2608_v1  ;;  %v2703_v25 = vadd.s32 80, %v2608_v1 }
  0x60   :  { %vm120_vm0 = vcmp.eq.s32.totalorder %v2608_v1, %v2629_v8  ;;  %vm121_vm1 = vcmp.eq.s32.totalorder %v2612_v3, %v2629_v8  ;;  %vm122_vm2 = vcmp.eq.s32.totalorder %v2615_v4, %v2629_v8  ;;  %vm123_vm3 = vcmp.eq.s32.totalorder %v2618_v5, %v2629_v8 }
  0x61   :  { %vm1516_vm4 = vmpackc.low %vm121_vm1, %vm120_vm0  ;;  %vm124_vm6 = vcmp.eq.s32.totalorder %v2626_v7, %v2629_v8  ;;  %vm125_vm7 = vcmp.eq.s32.totalorder %v2632_v9, %v2629_v8  ;;  %v2683_v21 = vrot.slane %v2623_v6, %v699_v16  ;;  %v2686_v22 = vrot.slane %v2623_v6, %v894_v17 }
  0x62   :  { %2006 = vmatprep.subr.msk.bf16.mxu1 %vm1516_vm4, %v2473_v13  ;;  %2026 = vmatprep.subr.msk.bf16.mxu0 %vm1516_vm4, %v2473_v13  ;;  %vm2653_vm5 = vmpackc.low %vm123_vm3, %vm122_vm2  ;;  %vm126_vm9 = vcmp.eq.s32.totalorder %v2649_v12, %v2629_v8  ;;  %vm127_vm10 = vcmp.eq.s32.totalorder %v2662_v15, %v2629_v8  ;;  %v2712_v26 = vadd.s32 88, %v2608_v1  ;;  %v2715_v27 = vadd.s32 96, %v2608_v1 }
  0x63   :  { %2007 = vmatpush3.bf16.msk.msra.mxu1 %vm1516_vm4, %v2473_v13  ;;  %2027 = vmatpush3.bf16.msk.msra.mxu0 %vm1516_vm4, %v2473_v13  ;;  %vm2674_vm8 = vmpackc.low %vm125_vm7, %vm124_vm6  ;;  %v2718_v28 = vadd.s32 104, %v2608_v1  ;;  %v2725_v30 = vadd.s32 112, %v2608_v1  ;;  %v2728_v31 = vadd.s32 120, %v2608_v1  ;;  %v2731_v32 = vrot.slane %v2623_v6, %v309_v20 }
  0x64   :  { %2008 = vmatprep.subr.msk.bf16.mxu1 %vm2653_vm5, %v2473_v13  ;;  %2028 = vmatprep.subr.msk.bf16.mxu0 %vm2653_vm5, %v2473_v13  ;;  %vm2720_vm11 = vmpackc.low %vm127_vm10, %vm126_vm9  ;;  %vm128_vm12 = vcmp.eq.s32.totalorder %v2679_v19, %v2629_v8  ;;  %vm129_vm13 = vcmp.eq.s32.totalorder %v2693_v23, %v2629_v8  ;;  %v2738_v33 = vrot.slane %v2623_v6, %v504_v24  ;;  %v1089_v48 = vsub.s32 5, %v2608_v1 }
  0x65   :  { %vm130_vm14 = vcmp.eq.s32.totalorder %v2703_v25, %v2629_v8  ;;  %vm131_vm15 = vcmp.eq.s32.totalorder %v2712_v26, %v2629_v8  ;;  %vm132_vm0 = vcmp.eq.s32.totalorder %v2715_v27, %v2629_v8  ;;  %vm133_vm1 = vcmp.eq.s32.totalorder %v2718_v28, %v2629_v8  ;;  %vm2760_vm2 = vmpackc.low %vm129_vm13, %vm128_vm12 }
  0x66   :  { %vm134_vm3 = vcmp.eq.s32.totalorder %v2725_v30, %v2629_v8  ;;  %vm135_vm4 = vcmp.eq.s32.totalorder %v2728_v31, %v2629_v8  ;;  %vm312_vm6 = vcmp.eq.s32.totalorder %v2612_v3, %v2731_v32  ;;  %vm506_vm7 = vcmp.eq.s32.totalorder %v2608_v1, %v2738_v33  ;;  %vm2814_vm12 = vmpackc.low %vm131_vm15, %vm130_vm14 }
  0x67   :  { %2009 = vmatpush3.bf16.msk.msra.mxu1 %vm2653_vm5, %v2473_v13  ;;  %2029 = vmatpush3.bf16.msk.msra.mxu0 %vm2653_vm5, %v2473_v13  ;;  %vm311_vm5 = vcmp.eq.s32.totalorder %v2608_v1, %v2731_v32  ;;  %vm2864_vm15 = vmpackc.low %vm133_vm1, %vm132_vm0  ;;  %vm4107_vm14 = vcmp.eq.s32.totalorder %v2618_v5, %v2731_v32  ;;  %vm4115_vm1 = vcmp.eq.s32.totalorder %v2612_v3, %v2683_v21  ;;  %v1284_v49 = vsub.s32 6, %v2608_v1 }
  0x68   :  { %2010 = vmatprep.subr.msk.bf16.mxu1 %vm2674_vm8, %v2473_v13  ;;  %2030 = vmatprep.subr.msk.bf16.mxu0 %vm2674_vm8, %v2473_v13  ;;  %vm2882_vm0 = vmpackc.low %vm135_vm4, %vm134_vm3  ;;  %vm316_vm13 = vcmp.eq.s32.totalorder %v2632_v9, %v2731_v32  ;;  %vm4118_vm10 = vcmp.eq.s32.totalorder %v2608_v1, %v2686_v22  ;;  %vm4122_vm9 = vcmp.eq.s32.totalorder %v2615_v4, %v2683_v21  ;;  %v4141_v53 = vmov 0 }
  0x69   :  { %vm2906_vm3 = vmpackc.low %vm312_vm6, %vm311_vm5  ;;  %vm4103_vm5 = vcmp.eq.s32.totalorder %v2612_v3, %v2738_v33  ;;  %v3062_v54 = vrot.slane %v2623_v6, %v1089_v48  ;;  %v3065_v55 = vrot.slane %v2623_v6, %v1284_v49  ;;  %v4145_v56 = vmov 0  ;;  %v2345_v48 = vld [vmem:[#allocation9 + $0x18] sm:$0xff]   ;;  %v2346_v49 = vld [vmem:[#allocation7] sm:$0xff]  }
  0x6a   :  { %v4102_v38 = vsel %vm2906_vm3, 4294967295, %v4101_v38  ;;  %vm2928_vm6 = vmpackc.low %vm4103_vm5, %vm506_vm7  ;;  %vm4111_vm7 = vcmp.eq.s32.totalorder %v2618_v5, %v2738_v33  ;;  %v4149_v59 = vmov 0  ;;  %v4157_v61 = vmov 0 }
  0x6b   :  { %2011 = vmatpush3.bf16.msk.msra.mxu1 %vm2674_vm8, %v2473_v13  ;;  %2031 = vmatpush3.bf16.msk.msra.mxu0 %vm2674_vm8, %v2473_v13  ;;  %v4105_v39 = vsel %vm2928_vm6, 4294967295, %v4104_v39  ;;  %vm4106_vm8 = vcmp.eq.s32.totalorder %v2615_v4, %v2731_v32  ;;  %v4161_v62 = vmov 0  ;;  %v4165_v63 = vmov 0 }
  0x6c   :  { %2012 = vmatprep.subr.msk.bf16.mxu1 %vm2720_vm11, %v2473_v13  ;;  %2032 = vmatprep.subr.msk.bf16.mxu0 %vm2720_vm11, %v2473_v13  ;;  %vm2940_vm4 = vmpackc.low %vm4107_vm14, %vm4106_vm8  ;;  %vm4123_vm14 = vcmp.eq.s32.totalorder %v2618_v5, %v2683_v21  ;;  %v4169_v0 = vmov 0  ;;  %v4173_v2 = vmov 0  ;;  %v4176_v6 = vmov 0 }
  0x6d   :  { %v4109_v40 = vsel %vm2940_vm4, 4294967295, %v4108_v40  ;;  %v4178_v8 = vmov 0  ;;  %v4182_v10 = vmov 0  ;;  %v4186_v11 = vmov 0 }
  0x6e   :  { %v4190_v14 = vmov 0  ;;  %v4194_v16 = vmov 0  ;;  %v4197_v17 = vmov 0  ;;  %v4199_v18 = vmov 0 }
  0x6f   :  { %2013 = vmatpush3.bf16.msk.msra.mxu1 %vm2720_vm11, %v2473_v13  ;;  %2033 = vmatpush3.bf16.msk.msra.mxu0 %vm2720_vm11, %v2473_v13  ;;  %vm2994_vm11 = vmpackc.low %vm4123_vm14, %vm4122_vm9  ;;  %vm4126_vm9 = vcmp.eq.s32.totalorder %v2615_v4, %v2686_v22  ;;  %vm4130_vm14 = vcmp.eq.s32.totalorder %v2626_v7, %v2731_v32  ;;  %v4203_v20 = vmov 0  ;;  %v4243_v24 = vmov 0 }
  0x70   :  { %2014 = vmatprep.subr.msk.bf16.mxu1 %vm2760_vm2, %v2473_v13  ;;  %2034 = vmatprep.subr.msk.bf16.mxu0 %vm2760_vm2, %v2473_v13  ;;  %v4125_v44 = vsel %vm2994_vm11, 4294967295, %v4124_v44 }
  0x73   :  { %2015 = vmatpush3.bf16.msk.msra.mxu1 %vm2760_vm2, %v2473_v13  ;;  %2035 = vmatpush3.bf16.msk.msra.mxu0 %vm2760_vm2, %v2473_v13  ;;  %vm4110_vm2 = vcmp.eq.s32.totalorder %v2615_v4, %v2738_v33 }
  0x74   :  { %2016 = vmatprep.subr.msk.bf16.mxu1 %vm2814_vm12, %v2473_v13  ;;  %2036 = vmatprep.subr.msk.bf16.mxu0 %vm2814_vm12, %v2473_v13  ;;  %vm2950_vm5 = vmpackc.low %vm4111_vm7, %vm4110_vm2  ;;  %vm510_vm2 = vcmp.eq.s32.totalorder %v2626_v7, %v2738_v33  ;;  %vm511_vm7 = vcmp.eq.s32.totalorder %v2632_v9, %v2738_v33 }
  0x75   :  { %v4113_v41 = vsel %vm2950_vm5, 4294967295, %v4112_v41  ;;  %vm3029_vm11 = vmpackc.low %vm511_vm7, %vm510_vm2  ;;  %vm515_vm2 = vcmp.eq.s32.totalorder %v2693_v23, %v2738_v33 }
  0x76   :  { %v4134_v51 = vsel %vm3029_vm11, 4294967295, %v4133_v51 }
  0x77   :  { %2017 = vmatpush3.bf16.msk.msra.mxu1 %vm2814_vm12, %v2473_v13  ;;  %2037 = vmatpush3.bf16.msk.msra.mxu0 %vm2814_vm12, %v2473_v13  ;;  %vm4114_vm12 = vcmp.eq.s32.totalorder %v2608_v1, %v2683_v21 }
  0x78   :  { %2018 = vmatprep.subr.msk.bf16.mxu1 %vm2864_vm15, %v2473_v13  ;;  %2038 = vmatprep.subr.msk.bf16.mxu0 %vm2864_vm15, %v2473_v13  ;;  %vm2960_vm8 = vmpackc.low %vm4115_vm1, %vm4114_vm12  ;;  %vm4119_vm1 = vcmp.eq.s32.totalorder %v2612_v3, %v2686_v22 }
  0x79   :  { %v4117_v42 = vsel %vm2960_vm8, 4294967295, %v4116_v42  ;;  %vm2978_vm12 = vmpackc.low %vm4119_vm1, %vm4118_vm10  ;;  %vm4127_vm10 = vcmp.eq.s32.totalorder %v2618_v5, %v2686_v22  ;;  %vm4168_vm8 = vcmp.eq.s32.totalorder %v2712_v26, %v2683_v21 }
  0x7a   :  { %v4121_v43 = vsel %vm2978_vm12, 4294967295, %v4120_v43  ;;  %vm3025_vm1 = vmpackc.low %vm316_vm13, %vm4130_vm14  ;;  %vm4136_vm12 = vcmp.eq.s32.totalorder %v2632_v9, %v2683_v21  ;;  %vm4139_vm14 = vcmp.eq.s32.totalorder %v2626_v7, %v2686_v22 }
  0x7b   :  { %2019 = vmatpush3.bf16.msk.msra.mxu1 %vm2864_vm15, %v2473_v13  ;;  %2039 = vmatpush3.bf16.msk.msra.mxu0 %vm2864_vm15, %v2473_v13  ;;  %vm3016_vm15 = vmpackc.low %vm4127_vm10, %vm4126_vm9  ;;  %v4132_v50 = vsel %vm3025_vm1, 4294967295, %v4131_v50  ;;  %vm4140_vm10 = vcmp.eq.s32.totalorder %v2632_v9, %v2686_v22 }
  0x7c   :  { %2020 = vmatprep.subr.msk.bf16.mxu1 %vm2882_vm0, %v2473_v13  ;;  %2040 = vmatprep.subr.msk.bf16.mxu0 %vm2882_vm0, %v2473_v13  ;;  %v4129_v47 = vsel %vm3016_vm15, 4294967295, %v4128_v47  ;;  %vm4135_vm15 = vcmp.eq.s32.totalorder %v2626_v7, %v2683_v21  ;;  %vm3057_vm9 = vmpackc.low %vm4140_vm10, %vm4139_vm14  ;;  %vm4148_vm14 = vcmp.eq.s32.totalorder %v2662_v15, %v2686_v22 }
  0x7d   :  { %vm3043_vm13 = vmpackc.low %vm4136_vm12, %vm4135_vm15  ;;  %v4142_v53 = vsel %vm3057_vm9, 4294967295, %v4141_v53  ;;  %vm4143_vm12 = vcmp.eq.s32.totalorder %v2649_v12, %v2683_v21  ;;  %vm4144_vm15 = vcmp.eq.s32.totalorder %v2662_v15, %v2683_v21  ;;  %vm4152_vm9 = vcmp.eq.s32.totalorder %v2662_v15, %v2731_v32 }
  0x7e   :  { %v4138_v52 = vsel %vm3043_vm13, 4294967295, %v4137_v52  ;;  %vm3079_vm10 = vmpackc.low %vm4144_vm15, %vm4143_vm12  ;;  %vm4159_vm15 = vcmp.eq.s32.totalorder %v2679_v19, %v2683_v21 }
  0x7f   :  { %2021 = vmatpush3.bf16.msk.msra.mxu1 %vm2882_vm0, %v2473_v13  ;;  %2041 = vmatpush3.bf16.msk.msra.mxu0 %vm2882_vm0, %v2473_v13  ;;  %v4146_v56 = vsel %vm3079_vm10, 4294967295, %v4145_v56  ;;  %vm4147_vm0 = vcmp.eq.s32.totalorder %v2649_v12, %v2686_v22  ;;  %vm4151_vm10 = vcmp.eq.s32.totalorder %v2649_v12, %v2731_v32 }
  0x80   :  { %2046 = vmatprep.subr.msk.bf16.mxu1 %vm2906_vm3, %v2473_v13  ;;  %2086 = vmatprep.subr.msk.bf16.mxu0 %vm2928_vm6, %v2473_v13  ;;  %vm3098_vm12 = vmpackc.low %vm4148_vm14, %vm4147_vm0  ;;  %vm4155_vm0 = vcmp.eq.s32.totalorder %v2649_v12, %v2738_v33  ;;  %vm4156_vm14 = vcmp.eq.s32.totalorder %v2662_v15, %v2738_v33 }
  0x81   :  { %v4150_v59 = vsel %vm3098_vm12, 4294967295, %v4149_v59  ;;  %vm3114_vm13 = vmpackc.low %vm4152_vm9, %vm4151_vm10  ;;  %vm4160_vm9 = vcmp.eq.s32.totalorder %v2693_v23, %v2683_v21  ;;  %vm4167_vm12 = vcmp.eq.s32.totalorder %v2703_v25, %v2683_v21 }
  0x82   :  { %vm3124_vm7 = vmpackc.low %vm4156_vm14, %vm4155_vm0  ;;  %2023 = vmatmul.mubr.bf16.vlgmr.msra.gmra.mrb[0].mxu1 %v2324_v45  ;;  %2043 = vmatmul.mubr.bf16.vlgmr.msra.gmra.mrb[0].mxu0 %v2325_v46  ;;  %vm320_vm0 = vcmp.eq.s32.totalorder %v2693_v23, %v2731_v32  ;;  %vm514_vm14 = vcmp.eq.s32.totalorder %v2679_v19, %v2738_v33  ;;  %v2339_v45 = vld [vmem:[#allocation6] sm:$0xff]   ;;  %v2343_v46 = vld [vmem:[#allocation9 + $0x10] sm:$0xff]  }
  0x83   :  { %v4158_v61 = vsel %vm3124_vm7, 4294967295, %v4157_v61  ;;  %vm3136_vm10 = vmpackc.low %vm4160_vm9, %vm4159_vm15  ;;  %vm4163_vm15 = vcmp.eq.s32.totalorder %v2679_v19, %v2686_v22  ;;  %vm4164_vm9 = vcmp.eq.s32.totalorder %v2693_v23, %v2686_v22  ;;  %2047 = vmatpush3.bf16.msk.msra.mxu1 %vm2906_vm3, %v2473_v13  ;;  %2087 = vmatpush3.bf16.msk.msra.mxu0 %vm2928_vm6, %v2473_v13 }
  0x84   :  { %v4162_v62 = vsel %vm3136_vm10, 4294967295, %v4161_v62  ;;  %vm3154_vm10 = vmpackc.low %vm4164_vm9, %vm4163_vm15  ;;  %2048 = vmatprep.subr.msk.bf16.mxu1 %vm2940_vm4, %v2473_v13  ;;  %2088 = vmatprep.subr.msk.bf16.mxu0 %vm2950_vm5, %v2473_v13  ;;  %vm4184_vm9 = vcmp.eq.s32.totalorder %v2715_v27, %v2686_v22 }
  0x85   :  { %v4166_v63 = vsel %vm3154_vm10, 4294967295, %v4165_v63  ;;  %vm3170_vm7 = vmpackc.low %vm4168_vm8, %vm4167_vm12  ;;  %vm4171_vm8 = vcmp.eq.s32.totalorder %v2703_v25, %v2686_v22  ;;  %vm4172_vm12 = vcmp.eq.s32.totalorder %v2712_v26, %v2686_v22  ;;  %vm4175_vm10 = vcmp.eq.s32.totalorder %v2679_v19, %v2731_v32  ;;  %2062 = vmatprep.mubr.bf16.mxu1 %v2326_v57  ;;  %2102 = vmatprep.mubr.bf16.mxu0 %v2327_v58 }
  0x86   :  { %v4170_v0 = vsel %vm3170_vm7, 4294967295, %v4169_v0  ;;  %vm3190_vm7 = vmpackc.low %vm4172_vm12, %vm4171_vm8  ;;  %vm4180_vm8 = vcmp.eq.s32.totalorder %v2715_v27, %v2683_v21  ;;  %vm4181_vm12 = vcmp.eq.s32.totalorder %v2718_v28, %v2683_v21 }
  0x87   :  { %v4174_v2 = vsel %vm3190_vm7, 4294967295, %v4173_v2  ;;  %vm3201_vm6 = vmpackc.low %vm320_vm0, %vm4175_vm10  ;;  %vm516_vm0 = vcmp.eq.s32.totalorder %v2703_v25, %v2738_v33  ;;  %2049 = vmatpush3.bf16.msk.msra.mxu1 %vm2940_vm4, %v2473_v13  ;;  %2089 = vmatpush3.bf16.msk.msra.mxu0 %vm2950_vm5, %v2473_v13  ;;  %vm4188_vm10 = vcmp.eq.s32.totalorder %v2725_v30, %v2683_v21 }
  0x88   :  { %v4177_v6 = vsel %vm3201_vm6, 4294967295, %v4176_v6  ;;  %vm3205_vm3 = vmpackc.low %vm515_vm2, %vm514_vm14  ;;  %vm322_vm2 = vcmp.eq.s32.totalorder %v2712_v26, %v2731_v32  ;;  %vm517_vm14 = vcmp.eq.s32.totalorder %v2712_v26, %v2738_v33  ;;  %2050 = vmatprep.subr.msk.bf16.mxu1 %vm3025_vm1, %v2473_v13  ;;  %2090 = vmatprep.subr.msk.bf16.mxu0 %vm3029_vm11, %v2473_v13 }
  0x89   :  { %v4179_v8 = vsel %vm3205_vm3, 4294967295, %v4178_v8  ;;  %vm3215_vm15 = vmpackc.low %vm4181_vm12, %vm4180_vm8  ;;  %vm4185_vm8 = vcmp.eq.s32.totalorder %v2718_v28, %v2686_v22 }
  0x8a   :  { %v4183_v10 = vsel %vm3215_vm15, 4294967295, %v4182_v10  ;;  %vm3233_vm12 = vmpackc.low %vm4185_vm8, %vm4184_vm9  ;;  %vm4189_vm15 = vcmp.eq.s32.totalorder %v2728_v31, %v2683_v21  ;;  %v4207_v21 = vmov 0 }
  0x8b   :  { %v4187_v11 = vsel %vm3233_vm12, 4294967295, %v4186_v11  ;;  %vm3249_vm7 = vmpackc.low %vm4189_vm15, %vm4188_vm10  ;;  %vm4192_vm15 = vcmp.eq.s32.totalorder %v2725_v30, %v2686_v22  ;;  %vm4193_vm10 = vcmp.eq.s32.totalorder %v2728_v31, %v2686_v22  ;;  %vm4196_vm12 = vcmp.eq.s32.totalorder %v2703_v25, %v2731_v32  ;;  %2051 = vmatpush3.bf16.msk.msra.mxu1 %vm3025_vm1, %v2473_v13  ;;  %2091 = vmatpush3.bf16.msk.msra.mxu0 %vm3029_vm11, %v2473_v13 }
  0x8c   :  { %v4191_v14 = vsel %vm3249_vm7, 4294967295, %v4190_v14  ;;  %vm3269_vm7 = vmpackc.low %vm4193_vm10, %vm4192_vm15  ;;  %vm4201_vm15 = vcmp.eq.s32.totalorder %v2608_v1, %v3062_v54  ;;  %vm4202_vm10 = vcmp.eq.s32.totalorder %v2612_v3, %v3062_v54  ;;  %2052 = vmatprep.subr.msk.bf16.mxu1 %vm3114_vm13, %v2473_v13  ;;  %vm1293_vm11 = vcmp.eq.s32.totalorder %v2662_v15, %v3065_v55 }
  0x8d   :  { %v4195_v16 = vsel %vm3269_vm7, 4294967295, %v4194_v16  ;;  %vm3280_vm5 = vmpackc.low %vm322_vm2, %vm4196_vm12  ;;  %vm323_vm2 = vcmp.eq.s32.totalorder %v2715_v27, %v2731_v32  ;;  %vm324_vm12 = vcmp.eq.s32.totalorder %v2718_v28, %v2731_v32  ;;  %vm1292_vm7 = vcmp.eq.s32.totalorder %v2649_v12, %v3065_v55 }
  0x8e   :  { %v4198_v17 = vsel %vm3280_vm5, 4294967295, %v4197_v17  ;;  %vm3284_vm4 = vmpackc.low %vm517_vm14, %vm516_vm0  ;;  %vm4205_vm0 = vcmp.eq.s32.totalorder %v2608_v1, %v3065_v55  ;;  %vm4206_vm14 = vcmp.eq.s32.totalorder %v2612_v3, %v3065_v55  ;;  %v4211_v1 = vmov 0 }
  0x8f   :  { %v4200_v18 = vsel %vm3284_vm4, 4294967295, %v4199_v18  ;;  %vm3294_vm8 = vmpackc.low %vm4202_vm10, %vm4201_vm15  ;;  %vm4209_vm15 = vcmp.eq.s32.totalorder %v2615_v4, %v3062_v54  ;;  %vm4210_vm10 = vcmp.eq.s32.totalorder %v2618_v5, %v3062_v54  ;;  %v4216_v3 = vmov 0  ;;  %2053 = vmatpush3.bf16.msk.msra.mxu1 %vm3114_vm13, %v2473_v13 }
  0x90   :  { %v4204_v20 = vsel %vm3294_vm8, 4294967295, %v4203_v20  ;;  %vm3308_vm9 = vmpackc.low %vm4206_vm14, %vm4205_vm0  ;;  %vm1097_vm0 = vcmp.eq.s32.totalorder %v2649_v12, %v3062_v54  ;;  %vm1098_vm14 = vcmp.eq.s32.totalorder %v2662_v15, %v3062_v54  ;;  %vm4220_vm4 = vcmp.eq.s32.totalorder %v2626_v7, %v3062_v54  ;;  %2054 = vmatprep.subr.msk.bf16.mxu1 %vm3201_vm6, %v2473_v13 }
  0x91   :  { %v4208_v21 = vsel %vm3308_vm9, 4294967295, %v4207_v21  ;;  %vm3324_vm8 = vmpackc.low %vm4210_vm10, %vm4209_vm15  ;;  %vm4213_vm9 = vnez %v4158_v61  ;;  %vm4214_vm15 = vcmp.eq.s32.totalorder %v2615_v4, %v3065_v55  ;;  %vm4215_vm10 = vcmp.eq.s32.totalorder %v2618_v5, %v3065_v55 }
  0x92   :  { %v4212_v1 = vsel %vm3324_vm8, 4294967295, %v4211_v1  ;;  %2092 = vmatprep.subr.msk.bf16.mxu0 %vm4213_vm9, %v2473_v13  ;;  %vm3344_vm8 = vmpackc.low %vm4215_vm10, %vm4214_vm15  ;;  %vm4221_vm5 = vcmp.eq.s32.totalorder %v2632_v9, %v3062_v54  ;;  %v4222_v4 = vmov 0  ;;  %vm4224_vm10 = vcmp.eq.s32.totalorder %v2626_v7, %v3065_v55 }
  0x93   :  { %v4217_v3 = vsel %vm3344_vm8, 4294967295, %v4216_v3  ;;  %vm3352_vm1 = vmpackc.low %vm324_vm12, %vm323_vm2  ;;  %vm4225_vm8 = vcmp.eq.s32.totalorder %v2632_v9, %v3065_v55  ;;  %v4226_v5 = vmov 0  ;;  %2093 = vmatpush3.bf16.msk.msra.mxu0 %vm4213_vm9, %v2473_v13  ;;  %v4228_v7 = vmov 0  ;;  %2055 = vmatpush3.bf16.msk.msra.mxu1 %vm3201_vm6, %v2473_v13 }
  0x94   :  { %vm3362_vm15 = vmpackc.low %vm4221_vm5, %vm4220_vm4  ;;  %vm1100_vm12 = vcmp.eq.s32.totalorder %v2693_v23, %v3062_v54  ;;  %2094 = vmatprep.subr.msk.bf16.mxu0 %vm3205_vm3, %v2473_v13  ;;  %v4230_v9 = vmov 0  ;;  %vm1295_vm4 = vcmp.eq.s32.totalorder %v2693_v23, %v3065_v55  ;;  %v4232_v12 = vmov 0 }
  0x95   :  { %v4223_v4 = vsel %vm3362_vm15, 4294967295, %v4222_v4  ;;  %vm3372_vm2 = vmpackc.low %vm4225_vm8, %vm4224_vm10  ;;  %vm1099_vm8 = vcmp.eq.s32.totalorder %v2679_v19, %v3062_v54  ;;  %vm1294_vm10 = vcmp.eq.s32.totalorder %v2679_v19, %v3065_v55  ;;  %v4234_v15 = vmov 0 }
  0x96   :  { %v4227_v5 = vsel %vm3372_vm2, 4294967295, %v4226_v5  ;;  %vm3384_vm5 = vmpackc.low %vm1098_vm14, %vm1097_vm0  ;;  %vm519_vm0 = vcmp.eq.s32.totalorder %v2718_v28, %v2738_v33  ;;  %vm4239_vm15 = vnez %v4198_v17  ;;  %vm4240_vm2 = vnez %v4200_v18 }
  0x97   :  { %v4229_v7 = vsel %vm3384_vm5, 4294967295, %v4228_v7  ;;  %vm3400_vm14 = vmpackc.low %vm1293_vm11, %vm1292_vm7  ;;  %2095 = vmatpush3.bf16.msk.msra.mxu0 %vm3205_vm3, %v2473_v13  ;;  %vm4236_vm7 = vcmp.eq.s32.totalorder %v2715_v27, %v2738_v33  ;;  %2056 = vmatprep.subr.msk.bf16.mxu1 %vm4239_vm15, %v2473_v13  ;;  %v4241_v23 = vmov 0  ;;  %vm4245_vm3 = vcmp.eq.s32.totalorder %v2725_v30, %v2731_v32 }
  0x98   :  { %v4231_v9 = vsel %vm3400_vm14, 4294967295, %v4230_v9  ;;  %vm3408_vm5 = vmpackc.low %vm1100_vm12, %vm1099_vm8  ;;  %vm1101_vm12 = vcmp.eq.s32.totalorder %v2703_v25, %v3062_v54  ;;  %2096 = vmatprep.subr.msk.bf16.mxu0 %vm4240_vm2, %v2473_v13  ;;  %vm4246_vm6 = vcmp.eq.s32.totalorder %v2728_v31, %v2731_v32  ;;  %2057 = vmatpush3.bf16.msk.msra.mxu1 %vm4239_vm15, %v2473_v13  ;;  %v4253_v32 = vmov 0 }
  0x99   :  { %v4233_v12 = vsel %vm3408_vm5, 4294967295, %v4232_v12  ;;  %vm3416_vm11 = vmpackc.low %vm1295_vm4, %vm1294_vm10  ;;  %vm520_vm4 = vcmp.eq.s32.totalorder %v2725_v30, %v2738_v33  ;;  %vm1102_vm10 = vcmp.eq.s32.totalorder %v2712_v26, %v3062_v54  ;;  %vm1297_vm5 = vcmp.eq.s32.totalorder %v2712_v26, %v3065_v55  ;;  %2058 = vmatprep.subr.msk.bf16.mxu1 %vm3352_vm1, %v2473_v13 }
  0x9a   :  { %v4235_v15 = vsel %vm3416_vm11, 4294967295, %v4234_v15  ;;  %vm3429_vm8 = vmpackc.low %vm519_vm0, %vm4236_vm7  ;;  %vm521_vm0 = vcmp.eq.s32.totalorder %v2728_v31, %v2738_v33  ;;  %vm1296_vm11 = vcmp.eq.s32.totalorder %v2703_v25, %v3065_v55  ;;  %v4251_v26 = vmov 0  ;;  %v2328_v33 = vld [vmem:[#allocation2 + $0x18] sm:$0xff]  }
  0x9b   :  { %vm3447_vm7 = vmpackc.low %vm1102_vm10, %vm1101_vm12  ;;  %2097 = vmatpush3.bf16.msk.msra.mxu0 %vm4240_vm2, %v2473_v13  ;;  %vm1299_vm10 = vcmp.eq.s32.totalorder %v2718_v28, %v3065_v55 }
  0x9c   :  { %v4242_v23 = vsel %vm3447_vm7, 4294967295, %v4241_v23  ;;  %vm3455_vm14 = vmpackc.low %vm1297_vm5, %vm1296_vm11  ;;  %vm1103_vm11 = vcmp.eq.s32.totalorder %v2715_v27, %v3062_v54  ;;  %2098 = vmatprep.subr.msk.bf16.mxu0 %vm3429_vm8, %v2473_v13  ;;  %2059 = vmatpush3.bf16.msk.msra.mxu1 %vm3352_vm1, %v2473_v13  ;;  %vm4282_vm7 = vnez %v4195_v16 }
  0x9d   :  { %v4244_v24 = vsel %vm3455_vm14, 4294967295, %v4243_v24  ;;  %vm3465_vm12 = vmpackc.low %vm4246_vm6, %vm4245_vm3  ;;  %vm1104_vm3 = vcmp.eq.s32.totalorder %v2718_v28, %v3062_v54  ;;  %v4257_v28 = vmov 0  ;;  %vm4281_vm14 = vnez %v4191_v14 }
  0x9e   :  { %vm3475_vm5 = vmpackc.low %vm521_vm0, %vm520_vm4  ;;  %vm1298_vm4 = vcmp.eq.s32.totalorder %v2715_v27, %v3065_v55  ;;  %2060 = vmatprep.subr.msk.bf16.mxu1 %vm3465_vm12, %v2473_v13  ;;  %v4255_v27 = vmov 0 }
  0x9f   :  { %vm3489_vm6 = vmpackc.low %vm1104_vm3, %vm1103_vm11  ;;  %2099 = vmatpush3.bf16.msk.msra.mxu0 %vm3429_vm8, %v2473_v13  ;;  %vm1105_vm11 = vcmp.eq.s32.totalorder %v2725_v30, %v3062_v54  ;;  %vm1106_vm3 = vcmp.eq.s32.totalorder %v2728_v31, %v3062_v54 }
  0xa0   :  { %v4252_v26 = vsel %vm3489_vm6, 4294967295, %v4251_v26  ;;  %vm3497_vm0 = vmpackc.low %vm1299_vm10, %vm1298_vm4  ;;  %2100 = vmatprep.subr.msk.bf16.mxu0 %vm3475_vm5, %v2473_v13  ;;  %vm1300_vm10 = vcmp.eq.s32.totalorder %v2725_v30, %v3065_v55  ;;  %2061 = vmatpush3.bf16.msk.msra.mxu1 %vm3465_vm12, %v2473_v13  ;;  %v2330_v30 = vld [vmem:[#allocation2] sm:$0xff]  }
  0xa1   :  { %v4254_v32 = vsel %vm3497_vm0, 4294967295, %v4253_v32  ;;  %vm3517_vm4 = vmpackc.low %vm1106_vm3, %vm1105_vm11  ;;  %vm1301_vm0 = vcmp.eq.s32.totalorder %v2728_v31, %v3065_v55  ;;  %vm4259_vm11 = vnez %v4102_v38  ;;  %v2331_v31 = vld [vmem:[%s4030_s3] sm:$0xff]   ;;  %vm4261_vm3 = vnez %v4109_v40  ;;  %v2335_v38 = vld [vmem:[#allocation6 + $0x10] sm:$0xff]  }
  0xa2   :  { %v4256_v27 = vsel %vm3517_vm4, 4294967295, %v4255_v27  ;;  %vm3525_vm6 = vmpackc.low %vm1301_vm0, %vm1300_vm10  ;;  %2066 = vmatprep.subr.msk.bf16.mxu1 %vm4259_vm11, %v2473_v13  ;;  %vm4260_vm0 = vnez %v4105_v39  ;;  %vm4262_vm10 = vnez %v4113_v41  ;;  %vm4280_vm4 = vnez %v4187_v11  ;;  %v2336_v39 = vld [vmem:[#allocation4 + $0x18] sm:$0xff]   ;;  %v2338_v41 = vld [vmem:[#allocation4] sm:$0xff]  }
  0xa3   :  { %v4258_v28 = vsel %vm3525_vm6, 4294967295, %v4257_v28  ;;  %2101 = vmatpush3.bf16.msk.msra.mxu0 %vm3475_vm5, %v2473_v13  ;;  %2063 = vmatmul.mubr.bf16.vlgmr.msra.gmra.mrb[4].mxu1 %v2328_v33  ;;  %vm4279_vm6 = vnez %v4183_v10  ;;  %v2337_v40 = vld [vmem:[#allocation6 + $0x18] sm:$0xff]  }
  0xa4   :  { %2106 = vmatprep.subr.msk.bf16.mxu0 %vm4260_vm0, %v2473_v13  ;;  %2067 = vmatpush3.bf16.msk.msra.mxu1 %vm4259_vm11, %v2473_v13  ;;  %vm4263_vm11 = vnez %v4132_v50  ;;  %v2347_v50 = vld [vmem:[#allocation9] sm:$0xff]  }
  0xa5   :  { %2068 = vmatprep.subr.msk.bf16.mxu1 %vm4261_vm3, %v2473_v13  ;;  %2082 = vmatprep.mubr.bf16.mxu1 %v2330_v30 }
  0xa6   :  { %2103 = vmatmul.mubr.bf16.vlgmr.msra.gmra.mrb[4].mxu0 %v2329_v34 }
  0xa7   :  { %2107 = vmatpush3.bf16.msk.msra.mxu0 %vm4260_vm0, %v2473_v13  ;;  %2122 = vmatprep.mubr.bf16.mxu0 %v2331_v31  ;;  %vm4264_vm0 = vnez %v4134_v51  ;;  %v2348_v51 = vld [vmem:[#allocation7 + $0x8] sm:$0xff]  }
  0xa8   :  { %2108 = vmatprep.subr.msk.bf16.mxu0 %vm4262_vm10, %v2473_v13  ;;  %2069 = vmatpush3.bf16.msk.msra.mxu1 %vm4261_vm3, %v2473_v13  ;;  %vm4265_vm3 = vnez %v4177_v6 }
  0xa9   :  { %2070 = vmatprep.subr.msk.bf16.mxu1 %vm4263_vm11, %v2473_v13 }
  0xab   :  { %2109 = vmatpush3.bf16.msk.msra.mxu0 %vm4262_vm10, %v2473_v13  ;;  %vm4266_vm10 = vnez %v4179_v8 }
  0xac   :  { %2110 = vmatprep.subr.msk.bf16.mxu0 %vm4264_vm0, %v2473_v13  ;;  %2071 = vmatpush3.bf16.msk.msra.mxu1 %vm4263_vm11, %v2473_v13  ;;  %vm4275_vm11 = vnez %v4162_v62 }
  0xad   :  { %2072 = vmatprep.subr.msk.bf16.mxu1 %vm3114_vm13, %v2473_v13 }
  0xaf   :  { %2111 = vmatpush3.bf16.msk.msra.mxu0 %vm4264_vm0, %v2473_v13  ;;  %vm4276_vm0 = vnez %v4166_v63 }
  0xb0   :  { %2112 = vmatprep.subr.msk.bf16.mxu0 %vm4213_vm9, %v2473_v13  ;;  %2073 = vmatpush3.bf16.msk.msra.mxu1 %vm3114_vm13, %v2473_v13  ;;  %vm4268_vm13 = vnez %v4121_v43  ;;  %v2341_v43 = vld [vmem:[#allocation6 + $0x8] sm:$0xff]  }
  0xb1   :  { %2074 = vmatprep.subr.msk.bf16.mxu1 %vm4265_vm3, %v2473_v13 }
  0xb3   :  { %2113 = vmatpush3.bf16.msk.msra.mxu0 %vm4213_vm9, %v2473_v13  ;;  %vm4269_vm9 = vnez %v4125_v44  ;;  %v2342_v44 = vld [vmem:[#allocation7 + $0x10] sm:$0xff]  }
  0xb4   :  { %2114 = vmatprep.subr.msk.bf16.mxu0 %vm4266_vm10, %v2473_v13  ;;  %2075 = vmatpush3.bf16.msk.msra.mxu1 %vm4265_vm3, %v2473_v13  ;;  %vm4277_vm3 = vnez %v4170_v0 }
  0xb5   :  { %2076 = vmatprep.subr.msk.bf16.mxu1 %vm4239_vm15, %v2473_v13 }
  0xb7   :  { %2115 = vmatpush3.bf16.msk.msra.mxu0 %vm4266_vm10, %v2473_v13  ;;  %vm4278_vm10 = vnez %v4174_v2 }
  0xb8   :  { %2116 = vmatprep.subr.msk.bf16.mxu0 %vm4240_vm2, %v2473_v13  ;;  %2077 = vmatpush3.bf16.msk.msra.mxu1 %vm4239_vm15, %v2473_v13  ;;  %vm4270_vm15 = vnez %v4129_v47  ;;  %v2344_v47 = vld [vmem:[#allocation7 + $0x18] sm:$0xff]  }
  0xb9   :  { %2078 = vmatprep.subr.msk.bf16.mxu1 %vm3352_vm1, %v2473_v13 }
  0xbb   :  { %2117 = vmatpush3.bf16.msk.msra.mxu0 %vm4240_vm2, %v2473_v13  ;;  %vm4271_vm2 = vnez %v4138_v52  ;;  %v2349_v52 = vld [vmem:[#allocation9 + $0x8] sm:$0xff]  }
  0xbc   :  { %2118 = vmatprep.subr.msk.bf16.mxu0 %vm3429_vm8, %v2473_v13  ;;  %2079 = vmatpush3.bf16.msk.msra.mxu1 %vm3352_vm1, %v2473_v13  ;;  %vm4267_vm1 = vnez %v4117_v42  ;;  %v2340_v42 = vld [vmem:[#allocation4 + $0x8] sm:$0xff]  }
  0xbd   :  { %2080 = vmatprep.subr.msk.bf16.mxu1 %vm3465_vm12, %v2473_v13 }
  0xbf   :  { %2119 = vmatpush3.bf16.msk.msra.mxu0 %vm3429_vm8, %v2473_v13  ;;  %vm4272_vm8 = vnez %v4142_v53 }
  0xc0   :  { %2120 = vmatprep.subr.msk.bf16.mxu0 %vm3475_vm5, %v2473_v13  ;;  %2081 = vmatpush3.bf16.msk.msra.mxu1 %vm3465_vm12, %v2473_v13  ;;  %vm4273_vm12 = vnez %v4146_v56 }
  0xc1   :  { %2126 = vmatprep.subr.msk.bf16.mxu1 %vm4267_vm1, %v2473_v13 }
  0xc3   :  { %2121 = vmatpush3.bf16.msk.msra.mxu0 %vm3475_vm5, %v2473_v13  ;;  %2083 = vmatmul.mubr.bf16.vlgmr.msra.gmra.mrb[4].mxu1 %v2332_v35  ;;  %vm4274_vm5 = vnez %v4150_v59 }
  0xc4   :  { %2166 = vmatprep.subr.msk.bf16.mxu0 %vm4268_vm13, %v2473_v13  ;;  %2127 = vmatpush3.bf16.msk.msra.mxu1 %vm4267_vm1, %v2473_v13 }
  0xc5   :  { %2128 = vmatprep.subr.msk.bf16.mxu1 %vm4269_vm9, %v2473_v13  ;;  %2142 = vmatprep.mubr.bf16.mxu1 %v2334_v37 }
  0xc6   :  { %2123 = vmatmul.mubr.bf16.vlgmr.msra.gmra.mrb[4].mxu0 %v2333_v36 }
  0xc7   :  { %2167 = vmatpush3.bf16.msk.msra.mxu0 %vm4268_vm13, %v2473_v13  ;;  %2182 = vmatprep.mubr.bf16.mxu0 %v2335_v38 }
  0xc8   :  { %2168 = vmatprep.subr.msk.bf16.mxu0 %vm4270_vm15, %v2473_v13  ;;  %2129 = vmatpush3.bf16.msk.msra.mxu1 %vm4269_vm9, %v2473_v13 }
  0xc9   :  { %2130 = vmatprep.subr.msk.bf16.mxu1 %vm4271_vm2, %v2473_v13 }
  0xcb   :  { %2169 = vmatpush3.bf16.msk.msra.mxu0 %vm4270_vm15, %v2473_v13 }
  0xcc   :  { %2170 = vmatprep.subr.msk.bf16.mxu0 %vm4272_vm8, %v2473_v13  ;;  %2131 = vmatpush3.bf16.msk.msra.mxu1 %vm4271_vm2, %v2473_v13 }
  0xcd   :  { %2132 = vmatprep.subr.msk.bf16.mxu1 %vm4273_vm12, %v2473_v13 }
  0xcf   :  { %2171 = vmatpush3.bf16.msk.msra.mxu0 %vm4272_vm8, %v2473_v13 }
  0xd0   :  { %2172 = vmatprep.subr.msk.bf16.mxu0 %vm4274_vm5, %v2473_v13  ;;  %2133 = vmatpush3.bf16.msk.msra.mxu1 %vm4273_vm12, %v2473_v13 }
  0xd1   :  { %2134 = vmatprep.subr.msk.bf16.mxu1 %vm4275_vm11, %v2473_v13 }
  0xd3   :  { %2173 = vmatpush3.bf16.msk.msra.mxu0 %vm4274_vm5, %v2473_v13 }
  0xd4   :  { %2174 = vmatprep.subr.msk.bf16.mxu0 %vm4276_vm0, %v2473_v13  ;;  %2135 = vmatpush3.bf16.msk.msra.mxu1 %vm4275_vm11, %v2473_v13 }
  0xd5   :  { %2136 = vmatprep.subr.msk.bf16.mxu1 %vm4277_vm3, %v2473_v13 }
  0xd7   :  { %2175 = vmatpush3.bf16.msk.msra.mxu0 %vm4276_vm0, %v2473_v13 }
  0xd8   :  { %2176 = vmatprep.subr.msk.bf16.mxu0 %vm4278_vm10, %v2473_v13  ;;  %2137 = vmatpush3.bf16.msk.msra.mxu1 %vm4277_vm3, %v2473_v13 }
  0xd9   :  { %2138 = vmatprep.subr.msk.bf16.mxu1 %vm4279_vm6, %v2473_v13 }
  0xdb   :  { %2177 = vmatpush3.bf16.msk.msra.mxu0 %vm4278_vm10, %v2473_v13 }
  0xdc   :  { %2178 = vmatprep.subr.msk.bf16.mxu0 %vm4280_vm4, %v2473_v13  ;;  %2139 = vmatpush3.bf16.msk.msra.mxu1 %vm4279_vm6, %v2473_v13 }
  0xdd   :  { %2140 = vmatprep.subr.msk.bf16.mxu1 %vm4281_vm14, %v2473_v13 }
  0xdf   :  { %2179 = vmatpush3.bf16.msk.msra.mxu0 %vm4280_vm4, %v2473_v13 }
  0xe0   :  { %2180 = vmatprep.subr.msk.bf16.mxu0 %vm4282_vm7, %v2473_v13  ;;  %2141 = vmatpush3.bf16.msk.msra.mxu1 %vm4281_vm14, %v2473_v13 }
  0xe1   :  { %2146 = vmatprep.subr.msk.bf16.mxu1 %vm4267_vm1, %v2473_v13 }
  0xe3   :  { %2181 = vmatpush3.bf16.msk.msra.mxu0 %vm4282_vm7, %v2473_v13  ;;  %2143 = vmatmul.mubr.bf16.vlgmr.msra.gmra.mrb[8].mxu1 %v2336_v39 }
  0xe4   :  { %2186 = vmatprep.subr.msk.bf16.mxu0 %vm4268_vm13, %v2473_v13  ;;  %2147 = vmatpush3.bf16.msk.msra.mxu1 %vm4267_vm1, %v2473_v13  ;;  %vm4287_vm1 = vnez %v4223_v4 }
  0xe5   :  { %2148 = vmatprep.subr.msk.bf16.mxu1 %vm4269_vm9, %v2473_v13  ;;  %2162 = vmatprep.mubr.bf16.mxu1 %v2338_v41 }
  0xe6   :  { %2183 = vmatmul.mubr.bf16.vlgmr.msra.gmra.mrb[8].mxu0 %v2337_v40 }
  0xe7   :  { %2187 = vmatpush3.bf16.msk.msra.mxu0 %vm4268_vm13, %v2473_v13  ;;  %2202 = vmatprep.mubr.bf16.mxu0 %v2339_v45  ;;  %vm4288_vm13 = vnez %v4227_v5 }
  0xe8   :  { %2188 = vmatprep.subr.msk.bf16.mxu0 %vm4270_vm15, %v2473_v13  ;;  %2149 = vmatpush3.bf16.msk.msra.mxu1 %vm4269_vm9, %v2473_v13  ;;  %vm4289_vm9 = vnez %v4229_v7 }
  0xe9   :  { %2150 = vmatprep.subr.msk.bf16.mxu1 %vm4271_vm2, %v2473_v13 }
  0xeb   :  { %2189 = vmatpush3.bf16.msk.msra.mxu0 %vm4270_vm15, %v2473_v13  ;;  %vm4290_vm15 = vnez %v4231_v9 }
  0xec   :  { %2190 = vmatprep.subr.msk.bf16.mxu0 %vm4272_vm8, %v2473_v13  ;;  %2151 = vmatpush3.bf16.msk.msra.mxu1 %vm4271_vm2, %v2473_v13  ;;  %vm4291_vm2 = vnez %v4233_v12 }
  0xed   :  { %2152 = vmatprep.subr.msk.bf16.mxu1 %vm4273_vm12, %v2473_v13 }
  0xef   :  { %2191 = vmatpush3.bf16.msk.msra.mxu0 %vm4272_vm8, %v2473_v13  ;;  %vm4292_vm8 = vnez %v4235_v15 }
  0xf0   :  { %2192 = vmatprep.subr.msk.bf16.mxu0 %vm4274_vm5, %v2473_v13  ;;  %2153 = vmatpush3.bf16.msk.msra.mxu1 %vm4273_vm12, %v2473_v13  ;;  %vm4293_vm12 = vnez %v4242_v23 }
  0xf1   :  { %2154 = vmatprep.subr.msk.bf16.mxu1 %vm4275_vm11, %v2473_v13 }
  0xf3   :  { %2193 = vmatpush3.bf16.msk.msra.mxu0 %vm4274_vm5, %v2473_v13  ;;  %vm4294_vm5 = vnez %v4244_v24 }
  0xf4   :  { %2194 = vmatprep.subr.msk.bf16.mxu0 %vm4276_vm0, %v2473_v13  ;;  %2155 = vmatpush3.bf16.msk.msra.mxu1 %vm4275_vm11, %v2473_v13  ;;  %vm4295_vm11 = vnez %v4252_v26 }
  0xf5   :  { %2156 = vmatprep.subr.msk.bf16.mxu1 %vm4277_vm3, %v2473_v13 }
  0xf7   :  { %2195 = vmatpush3.bf16.msk.msra.mxu0 %vm4276_vm0, %v2473_v13  ;;  %vm4296_vm0 = vnez %v4254_v32 }
  0xf8   :  { %2196 = vmatprep.subr.msk.bf16.mxu0 %vm4278_vm10, %v2473_v13  ;;  %2157 = vmatpush3.bf16.msk.msra.mxu1 %vm4277_vm3, %v2473_v13  ;;  %vm4297_vm3 = vnez %v4256_v27 }
  0xf9   :  { %2158 = vmatprep.subr.msk.bf16.mxu1 %vm4279_vm6, %v2473_v13 }
  0xfb   :  { %2197 = vmatpush3.bf16.msk.msra.mxu0 %vm4278_vm10, %v2473_v13  ;;  %vm4298_vm10 = vnez %v4258_v28 }
  0xfc   :  { %2198 = vmatprep.subr.msk.bf16.mxu0 %vm4280_vm4, %v2473_v13  ;;  %2159 = vmatpush3.bf16.msk.msra.mxu1 %vm4279_vm6, %v2473_v13  ;;  %vm4283_vm6 = vnez %v4204_v20 }
  0xfd   :  { %2160 = vmatprep.subr.msk.bf16.mxu1 %vm4281_vm14, %v2473_v13 }
  0xff   :  { %2199 = vmatpush3.bf16.msk.msra.mxu0 %vm4280_vm4, %v2473_v13  ;;  %vm4284_vm4 = vnez %v4208_v21 }
 0x100   :  { %2200 = vmatprep.subr.msk.bf16.mxu0 %vm4282_vm7, %v2473_v13  ;;  %2161 = vmatpush3.bf16.msk.msra.mxu1 %vm4281_vm14, %v2473_v13  ;;  %vm4285_vm14 = vnez %v4212_v1 }
 0x101   :  { %2206 = vmatprep.subr.msk.bf16.mxu1 %vm4283_vm6, %v2473_v13 }
 0x103   :  { %2201 = vmatpush3.bf16.msk.msra.mxu0 %vm4282_vm7, %v2473_v13  ;;  %2163 = vmatmul.mubr.bf16.vlgmr.msra.gmra.mrb[8].mxu1 %v2340_v42  ;;  %vm4286_vm7 = vnez %v4217_v3 }
 0x104   :  { %2246 = vmatprep.subr.msk.bf16.mxu0 %vm4284_vm4, %v2473_v13  ;;  %2207 = vmatpush3.bf16.msk.msra.mxu1 %vm4283_vm6, %v2473_v13 }
 0x105   :  { %2208 = vmatprep.subr.msk.bf16.mxu1 %vm4285_vm14, %v2473_v13  ;;  %2222 = vmatprep.mubr.bf16.mxu1 %v2342_v44 }
 0x106   :  { %2203 = vmatmul.mubr.bf16.vlgmr.msra.gmra.mrb[8].mxu0 %v2341_v43 }
 0x107   :  { %2247 = vmatpush3.bf16.msk.msra.mxu0 %vm4284_vm4, %v2473_v13  ;;  %2262 = vmatprep.mubr.bf16.mxu0 %v2343_v46 }
 0x108   :  { %2248 = vmatprep.subr.msk.bf16.mxu0 %vm4286_vm7, %v2473_v13  ;;  %2209 = vmatpush3.bf16.msk.msra.mxu1 %vm4285_vm14, %v2473_v13 }
 0x109   :  { %2210 = vmatprep.subr.msk.bf16.mxu1 %vm4287_vm1, %v2473_v13 }
 0x10b   :  { %2249 = vmatpush3.bf16.msk.msra.mxu0 %vm4286_vm7, %v2473_v13 }
 0x10c   :  { %2250 = vmatprep.subr.msk.bf16.mxu0 %vm4288_vm13, %v2473_v13  ;;  %2211 = vmatpush3.bf16.msk.msra.mxu1 %vm4287_vm1, %v2473_v13 }
 0x10d   :  { %2212 = vmatprep.subr.msk.bf16.mxu1 %vm4289_vm9, %v2473_v13 }
 0x10f   :  { %2251 = vmatpush3.bf16.msk.msra.mxu0 %vm4288_vm13, %v2473_v13 }
 0x110   :  { %2252 = vmatprep.subr.msk.bf16.mxu0 %vm4290_vm15, %v2473_v13  ;;  %2213 = vmatpush3.bf16.msk.msra.mxu1 %vm4289_vm9, %v2473_v13 }
 0x111   :  { %2214 = vmatprep.subr.msk.bf16.mxu1 %vm4291_vm2, %v2473_v13 }
 0x113   :  { %2253 = vmatpush3.bf16.msk.msra.mxu0 %vm4290_vm15, %v2473_v13 }
 0x114   :  { %2254 = vmatprep.subr.msk.bf16.mxu0 %vm4292_vm8, %v2473_v13  ;;  %2215 = vmatpush3.bf16.msk.msra.mxu1 %vm4291_vm2, %v2473_v13 }
 0x115   :  { %2216 = vmatprep.subr.msk.bf16.mxu1 %vm4293_vm12, %v2473_v13 }
 0x117   :  { %2255 = vmatpush3.bf16.msk.msra.mxu0 %vm4292_vm8, %v2473_v13 }
 0x118   :  { %2256 = vmatprep.subr.msk.bf16.mxu0 %vm4294_vm5, %v2473_v13  ;;  %2217 = vmatpush3.bf16.msk.msra.mxu1 %vm4293_vm12, %v2473_v13 }
 0x119   :  { %2218 = vmatprep.subr.msk.bf16.mxu1 %vm4295_vm11, %v2473_v13 }
 0x11b   :  { %2257 = vmatpush3.bf16.msk.msra.mxu0 %vm4294_vm5, %v2473_v13 }
 0x11c   :  { %2258 = vmatprep.subr.msk.bf16.mxu0 %vm4296_vm0, %v2473_v13  ;;  %2219 = vmatpush3.bf16.msk.msra.mxu1 %vm4295_vm11, %v2473_v13 }
 0x11d   :  { %2220 = vmatprep.subr.msk.bf16.mxu1 %vm4297_vm3, %v2473_v13 }
 0x11f   :  { %2259 = vmatpush3.bf16.msk.msra.mxu0 %vm4296_vm0, %v2473_v13 }
 0x120   :  { %2260 = vmatprep.subr.msk.bf16.mxu0 %vm4298_vm10, %v2473_v13  ;;  %2221 = vmatpush3.bf16.msk.msra.mxu1 %vm4297_vm3, %v2473_v13 }
 0x121   :  { %2226 = vmatprep.subr.msk.bf16.mxu1 %vm4283_vm6, %v2473_v13 }
 0x123   :  { %2261 = vmatpush3.bf16.msk.msra.mxu0 %vm4298_vm10, %v2473_v13  ;;  %2223 = vmatmul.mubr.bf16.vlgmr.msra.gmra.mrb[12].mxu1 %v2344_v47 }
 0x124   :  { %2266 = vmatprep.subr.msk.bf16.mxu0 %vm4284_vm4, %v2473_v13  ;;  %2227 = vmatpush3.bf16.msk.msra.mxu1 %vm4283_vm6, %v2473_v13 }
 0x125   :  { %2228 = vmatprep.subr.msk.bf16.mxu1 %vm4285_vm14, %v2473_v13  ;;  %2242 = vmatprep.mubr.bf16.mxu1 %v2346_v49 }
 0x126   :  { %2263 = vmatmul.mubr.bf16.vlgmr.msra.gmra.mrb[12].mxu0 %v2345_v48 }
 0x127   :  { %2267 = vmatpush3.bf16.msk.msra.mxu0 %vm4284_vm4, %v2473_v13  ;;  %2282 = vmatprep.mubr.bf16.mxu0 %v2347_v50 }
 0x128   :  { %2268 = vmatprep.subr.msk.bf16.mxu0 %vm4286_vm7, %v2473_v13  ;;  %2229 = vmatpush3.bf16.msk.msra.mxu1 %vm4285_vm14, %v2473_v13 }
 0x129   :  { %2230 = vmatprep.subr.msk.bf16.mxu1 %vm4287_vm1, %v2473_v13 }
 0x12b   :  { %2269 = vmatpush3.bf16.msk.msra.mxu0 %vm4286_vm7, %v2473_v13 }
 0x12c   :  { %2270 = vmatprep.subr.msk.bf16.mxu0 %vm4288_vm13, %v2473_v13  ;;  %2231 = vmatpush3.bf16.msk.msra.mxu1 %vm4287_vm1, %v2473_v13 }
 0x12d   :  { %2232 = vmatprep.subr.msk.bf16.mxu1 %vm4289_vm9, %v2473_v13 }
 0x12f   :  { %2271 = vmatpush3.bf16.msk.msra.mxu0 %vm4288_vm13, %v2473_v13 }
 0x130   :  { %2272 = vmatprep.subr.msk.bf16.mxu0 %vm4290_vm15, %v2473_v13  ;;  %2233 = vmatpush3.bf16.msk.msra.mxu1 %vm4289_vm9, %v2473_v13 }
 0x131   :  { %2234 = vmatprep.subr.msk.bf16.mxu1 %vm4291_vm2, %v2473_v13 }
 0x133   :  { %2273 = vmatpush3.bf16.msk.msra.mxu0 %vm4290_vm15, %v2473_v13 }
 0x134   :  { %2274 = vmatprep.subr.msk.bf16.mxu0 %vm4292_vm8, %v2473_v13  ;;  %2235 = vmatpush3.bf16.msk.msra.mxu1 %vm4291_vm2, %v2473_v13 }
 0x135   :  { %2236 = vmatprep.subr.msk.bf16.mxu1 %vm4293_vm12, %v2473_v13 }
 0x137   :  { %2275 = vmatpush3.bf16.msk.msra.mxu0 %vm4292_vm8, %v2473_v13 }
 0x138   :  { %2276 = vmatprep.subr.msk.bf16.mxu0 %vm4294_vm5, %v2473_v13  ;;  %2237 = vmatpush3.bf16.msk.msra.mxu1 %vm4293_vm12, %v2473_v13 }
 0x139   :  { %2238 = vmatprep.subr.msk.bf16.mxu1 %vm4295_vm11, %v2473_v13 }
 0x13b   :  { %2277 = vmatpush3.bf16.msk.msra.mxu0 %vm4294_vm5, %v2473_v13 }
 0x13c   :  { %2278 = vmatprep.subr.msk.bf16.mxu0 %vm4296_vm0, %v2473_v13  ;;  %2239 = vmatpush3.bf16.msk.msra.mxu1 %vm4295_vm11, %v2473_v13 }
 0x13d   :  { %2240 = vmatprep.subr.msk.bf16.mxu1 %vm4297_vm3, %v2473_v13 }
 0x13f   :  { %2279 = vmatpush3.bf16.msk.msra.mxu0 %vm4296_vm0, %v2473_v13 }
 0x140   :  { %2280 = vmatprep.subr.msk.bf16.mxu0 %vm4298_vm10, %v2473_v13  ;;  %2241 = vmatpush3.bf16.msk.msra.mxu1 %vm4297_vm3, %v2473_v13 }
 0x143   :  { %2281 = vmatpush3.bf16.msk.msra.mxu0 %vm4298_vm10, %v2473_v13  ;;  %2243 = vmatmul.mubr.bf16.vlgmr.msra.gmra.mrb[12].mxu1 %v2348_v51 }
 0x146   :  { %2283 = vmatmul.mubr.bf16.vlgmr.msra.gmra.mrb[12].mxu0 %v2349_v52 }
 0x155   :  { %v2024_v53 = vpop.f32.mrb[0].mxu1  ;;  %v2044_v54 = vpop.f32.mrb[0].mxu0 }
 0x156   :  { %v301_v55 = vadd.f32 %v2044_v54, %v2024_v53  ;;  %v231_v56 = vpop.f32.mrb[1].mxu1  ;;  %v292_v57 = vpop.f32.mrb[1].mxu0 }
 0x157   :  { %v293_v58 = vadd.f32 %v292_v57, %v231_v56  ;;  %v2025_v59 = vpop.f32.mrb[2].mxu1  ;;  %v2045_v60 = vpop.f32.mrb[2].mxu0 }
 0x158   :  { %v304_v61 = vadd.f32 %v2045_v60, %v2025_v59  ;;  %v234_v62 = vpop.f32.mrb[3].mxu1  ;;  %v295_v63 = vpop.f32.mrb[3].mxu0 }
 0x159   :  { %v296_v0 = vadd.f32 %v295_v63, %v234_v62 }
 0x196   :  { %v2084_v2 = vpop.f32.mrb[4].mxu1 }
 0x197   :  { %v500_v8 = vmul.f32 %v2084_v2, %v301_v55  ;;  %v483_v10 = vpop.f32.mrb[5].mxu1 }
 0x198   :  { %v498_v13 = vmul.f32 %v483_v10, %v293_v58  ;;  %v2085_v14 = vpop.f32.mrb[6].mxu1 }
 0x199   :  { %v2124_v6 = vpop.f32.mrb[4].mxu0  ;;  %v501_v18 = vmul.f32 %v2085_v14, %v304_v61  ;;  %v486_v20 = vpop.f32.mrb[7].mxu1 }
 0x19a   :  { %v678_v11 = vpop.f32.mrb[5].mxu0  ;;  %v695_v17 = vmul.f32 %v2124_v6, %v500_v8  ;;  %v499_v3 = vmul.f32 %v486_v20, %v296_v0 }
 0x19b   :  { %v2125_v16 = vpop.f32.mrb[6].mxu0  ;;  %v693_v1 = vmul.f32 %v678_v11, %v498_v13 }
 0x19c   :  { %v681_v21 = vpop.f32.mrb[7].mxu0  ;;  %v696_v22 = vmul.f32 %v2125_v16, %v501_v18 }
 0x19d   :  { %v694_v4 = vmul.f32 %v681_v21, %v499_v3 }
 0x1d6   :  { %v2164_v5 = vpop.f32.mrb[8].mxu1 }
 0x1d7   :  { %v890_v9 = vmul.f32 %v2164_v5, %v695_v17  ;;  %v873_v12 = vpop.f32.mrb[9].mxu1 }
 0x1d8   :  { %v888_v19 = vmul.f32 %v873_v12, %v693_v1  ;;  %v2165_v23 = vpop.f32.mrb[10].mxu1 }
 0x1d9   :  { %v2204_v7 = vpop.f32.mrb[8].mxu0  ;;  %v891_v25 = vmul.f32 %v2165_v23, %v696_v22  ;;  %v876_v26 = vpop.f32.mrb[11].mxu1 }
 0x1da   :  { %v1068_v15 = vpop.f32.mrb[9].mxu0  ;;  %v1085_v29 = vmul.f32 %v2204_v7, %v890_v9  ;;  %v889_v28 = vmul.f32 %v876_v26, %v694_v4 }
 0x1db   :  { %v2205_v24 = vpop.f32.mrb[10].mxu0  ;;  %v1083_v27 = vmul.f32 %v1068_v15, %v888_v19 }
 0x1dc   :  { %v1071_v32 = vpop.f32.mrb[11].mxu0  ;;  %v1086_v33 = vmul.f32 %v2205_v24, %v891_v25 }
 0x1dd   :  { %v1084_v34 = vmul.f32 %v1071_v32, %v889_v28 }
 0x216   :  { %v2244_v30 = vpop.f32.mrb[12].mxu1 }
 0x217   :  { %v1280_v35 = vmul.f32 %v2244_v30, %v1085_v29  ;;  %v1263_v36 = vpop.f32.mrb[13].mxu1 }
 0x218   :  { %v1278_v38 = vmul.f32 %v1263_v36, %v1083_v27  ;;  %v2245_v39 = vpop.f32.mrb[14].mxu1 }
 0x219   :  { %v2284_v31 = vpop.f32.mrb[12].mxu0  ;;  %v1281_v45 = vmul.f32 %v2245_v39, %v1086_v33  ;;  %v1266_v42 = vpop.f32.mrb[15].mxu1 }
 0x21a   :  { %v1458_v37 = vpop.f32.mrb[13].mxu0  ;;  %v1475_v41 = vmul.f32 %v2284_v31, %v1280_v35  ;;  %v1279_v46 = vmul.f32 %v1266_v42, %v1084_v34 }
 0x21b   :  { %v2285_v40 = vpop.f32.mrb[14].mxu0  ;;  %v1473_v44 = vmul.f32 %v1458_v37, %v1278_v38 }
 0x21c   :  { %v1461_v43 = vpop.f32.mrb[15].mxu0  ;;  %v1476_v47 = vmul.f32 %v2285_v40, %v1281_v45 }
 0x21d   :  { %v1474_v48 = vmul.f32 %v1461_v43, %v1279_v46 }
 0x21f   :  { %v1477_v49 = vadd.f32 %v1474_v48, %v1473_v44 }
 0x221   :  { %v1478_v50 = vadd.f32 %v1477_v49, %v1475_v41 }
 0x223   :  { %v1479_v51 = vadd.f32 %v1478_v50, %v1476_v47 }
 0x225   :  { %v1480_v52 = vrot.slane %v1479_v51, 4 }
 0x227   :  { %v1481_v53 = vadd.f32 %v1480_v52, %v1479_v51 }
 0x229   :  { %v1482_v54 = vrot.slane %v1481_v53, 2 }
 0x22b   :  { %v1483_v55 = vadd.f32 %v1482_v54, %v1481_v53 }
 0x22d   :  { %v1484_v56 = vrot.slane %v1483_v55, 1 }
 0x22f   :  { %v1485_v57 = vadd.f32 %v1484_v56, %v1483_v55 }
 0x231   :  { %1486 = vst [vmem:[%s4035_s8] sm:$0x1] %v1485_v57 }
 0x232   :  { %1491 = vsyncpa [#allocation3], 1 }
 0x233   :  { %1492 = vsyncpa [#allocation5], 1 }
 0x234   :  { %1493 = vsyncpa [#allocation8], 1 }

</bundles_post_ra>
